<compile_context>
chip_gen: v7x
topology: tpu7x:2x2x1
jax: 0.10.0
libtpu: 0.0.40
codegen_flags: <defaults>
</compile_context>

<pallas_src>
import functools

import jax
import jax.numpy as jnp
from jax.experimental import pallas as pl
from jax.experimental.pallas import tpu as pltpu


def _biattention_kernel(q1_ref, q2_ref, vw_ref, vb_ref, qw_ref, qb_ref,
                        hmat_ref, hbias_ref, p_ref, logits_ref,
                        *, bb, glimpse, apply_mask, flat_out):
    K = q1_ref.shape[1]
    Q = q2_ref.shape[1]
    x_dim = q1_ref.shape[2]
    y_dim = q2_ref.shape[2]
    h3 = vw_ref.shape[1]

    q1 = q1_ref[...]                       # (BB, K, x_dim)  compute dtype
    q2 = q2_ref[...]                       # (BB, Q, y_dim)

    # ---- FCNet v_net / q_net: weight-normed Linear + ReLU (dropout=identity).
    # Batch folded into the MXU rows; bf16 (or f32) operands, f32 accumulation.
    v_feat = jnp.maximum(
        jnp.dot(q1.reshape(bb * K, x_dim), vw_ref[...],
                preferred_element_type=jnp.float32) + vb_ref[...], 0.0)   # (BB*K, h3) f32
    q_feat = jnp.maximum(
        jnp.dot(q2.reshape(bb * Q, y_dim), qw_ref[...],
                preferred_element_type=jnp.float32) + qb_ref[...], 0.0)   # (BB*Q, h3) f32

    v3 = v_feat.reshape(bb, K, h3)
    q3 = q_feat.reshape(bb, Q, h3)

    # ---- fused bilinear logits: one batched matmul covering every glimpse.
    # hv[b, g*K + k, :] = v_feat[b, k, :] * h_mat[g, :]
    hv_parts = []
    for g in range(glimpse):               # glimpse is small & static -> unrolled
        hm_g = hmat_ref[pl.ds(g, 1), :].astype(jnp.float32)       # (1, h3)
        hv_parts.append(v3 * hm_g[None, :, :])                    # (BB, K, h3)
    hv = jnp.concatenate(hv_parts, axis=1)                        # (BB, G*K, h3)

    lg = jnp.einsum('bjd,bqd->bjq',
                    hv.astype(q1.dtype), q3.astype(q1.dtype),
                    preferred_element_type=jnp.float32)           # (BB, G*K, Q) f32

    # h_bias[g] broadcast over its K rows (glimpse-hoisted, added once).
    hb_col = jnp.concatenate(
        [jnp.full((K, 1), hbias_ref[g, 0], dtype=jnp.float32)
         for g in range(glimpse)], axis=0)                        # (G*K, 1)
    lg = lg + hb_col[None, :, :]

    if apply_mask:
        # Rows of q1 whose abs-sum is exactly zero -> -inf logits (torch parity).
        row_zero = jnp.sum(jnp.abs(q1).astype(jnp.float32), axis=2,
                           keepdims=True) == 0.0                  # (BB, K, 1)
        neg = jnp.where(row_zero, jnp.float32(-jnp.inf), jnp.float32(0.0))
        lg = lg + jnp.concatenate([neg] * glimpse, axis=1)        # lane-broadcast

    # ---- softmax over the flattened (K*Q) axis per (batch, glimpse).
    if flat_out:
        # (g*K+k, q) -> (g, k*Q+q) preserves row-major order: pure relayout,
        # and gives a lane-dense (128-wide here) last dim for the stores.
        lg = lg.reshape(bb, glimpse, K * Q)
        m = jnp.max(lg, axis=2, keepdims=True)
        e = jnp.exp(lg - m)
        s = jnp.sum(e, axis=2, keepdims=True)
    else:
        lg = lg.reshape(bb, glimpse, K, Q)
        m = jnp.max(jnp.max(lg, axis=3, keepdims=True), axis=2, keepdims=True)
        e = jnp.exp(lg - m)
        s = jnp.sum(jnp.sum(e, axis=3, keepdims=True), axis=2, keepdims=True)
    p_ref[...] = e * pl.reciprocal(s, approx=True)
    logits_ref[...] = lg


def _pick_block_b(batch, target=8):
    """Largest divisor of `batch` <= target, preferring >= 2 grid steps
    (so the second TensorCore on v7x gets work)."""
    bb = min(batch, target)
    while batch % bb:
        bb -= 1
    if batch // bb < 2 and batch > 1:
        smaller = bb // 2
        while smaller >= 1 and batch % smaller:
            smaller -= 1
        if smaller >= 1:
            bb = smaller
    return max(bb, 1)


def biattention_forward(q1, q2, params, *, glimpse, v_mask=True,
                        block_b=None, use_bf16=True):
    """p, logits = BiAttention.forward_all(q1, q2, v_mask).
       q1: [B, K, x_dim], q2: [B, Q, y_dim] -> p, logits: [B, glimpse, K, Q]."""
    B, K, x_dim = q1.shape
    _, Q, y_dim = q2.shape
    vw, vb, qw, qb, h_mat, h_bias = params
    h3 = vw.shape[1]

    bb = _pick_block_b(B) if block_b is None else block_b
    assert B % bb == 0, "block_b must divide the batch size"

    cdt = jnp.bfloat16 if use_bf16 else jnp.float32
    q1c, q2c = q1.astype(cdt), q2.astype(cdt)
    vwc, qwc, hmc = vw.astype(cdt), qw.astype(cdt), h_mat.astype(cdt)
    vbf = vb.reshape(1, h3).astype(jnp.float32)
    qbf = qb.reshape(1, h3).astype(jnp.float32)
    hbf = h_bias.astype(jnp.float32).reshape(glimpse, 1)

    in_specs = [
        pl.BlockSpec((bb, K, x_dim), lambda b: (b, 0, 0)),         # q1 tile
        pl.BlockSpec((bb, Q, y_dim), lambda b: (b, 0, 0)),         # q2 tile
        # Grid-invariant weight blocks (DMA'd once).  TODO(synk): single-buffer
        # these (pipeline_mode) to free VMEM for larger bb when h3 is large.
        pl.BlockSpec((x_dim, h3), lambda b: (0, 0)),               # Wv
        pl.BlockSpec((1, h3), lambda b: (0, 0)),                   # bv
        pl.BlockSpec((y_dim, h3), lambda b: (0, 0)),               # Wq
        pl.BlockSpec((1, h3), lambda b: (0, 0)),                   # bq
        pl.BlockSpec((glimpse, h3), lambda b: (0, 0)),             # h_mat
        pl.BlockSpec(memory_space=pltpu.MemorySpace.SMEM),         # h_bias
    ]
    args = (q1c, q2c, vwc, vbf, qwc, qbf, hmc, hbf)

    def run(flat_out):
        if flat_out:
            out_shape = tuple(jax.ShapeDtypeStruct((B, glimpse, K * Q), jnp.float32)
                              for _ in range(2))
            out_specs = [pl.BlockSpec((bb, glimpse, K * Q), lambda b: (b, 0, 0))] * 2
        else:
            out_shape = tuple(jax.ShapeDtypeStruct((B, glimpse, K, Q), jnp.float32)
                              for _ in range(2))
            out_specs = [pl.BlockSpec((bb, glimpse, K, Q),
                                      lambda b: (b, 0, 0, 0))] * 2
        kernel = functools.partial(_biattention_kernel, bb=bb, glimpse=glimpse,
                                   apply_mask=v_mask, flat_out=flat_out)
        p_out, lg_out = pl.pallas_call(
            kernel,
            out_shape=out_shape,
            grid_spec=pltpu.PrefetchScalarGridSpec(
                num_scalar_prefetch=0,
                grid=(B // bb,),
                in_specs=in_specs,
                out_specs=out_specs),
            compiler_params=pltpu.CompilerParams(
                dimension_semantics=("parallel",)),
        )(*args)
        return (p_out.reshape(B, glimpse, K, Q),
                lg_out.reshape(B, glimpse, K, Q))

    try:
        out = run(True)                      # lane-dense (B, G, K*Q) stores
        jax.block_until_ready(out)
        return out
    except Exception:
        # TODO(synk): some Mosaic versions reject the in-kernel (K,Q)->(K*Q)
        # lane-collapsing relayout; fall back to the proven 4-D store layout.
        return run(False)


def _weight_norm(v):
    # torch weight_norm with dim=None: w = g * v / ||v||_F, g initialized to
    # ||v||_F, so the effective weight equals v at init.  Kept explicit to
    # preserve the semantics.
    g = jnp.sqrt(jnp.sum(v * v))
    return g * v / jnp.sqrt(jnp.sum(v * v))


if __name__ == "__main__":
    # Small-but-aligned shapes consistent with the module:
    #   q1=[B,K,x_dim], q2=[B,Q,y_dim]; h_dim = z_dim * k (k=3 in BCNet).
    B, K, Q = 8, 16, 8
    x_dim, y_dim, z_dim, glimpse, kk = 128, 128, 128, 2, 3
    h3 = z_dim * kk

    key = jax.random.PRNGKey(0)
    keys = jax.random.split(key, 8)
    q1 = jax.random.normal(keys[0], (B, K, x_dim), jnp.float32)
    q1 = q1.at[:, -1, :].set(0.0)            # zero rows exercise the v_mask path
    q2 = jax.random.normal(keys[1], (B, Q, y_dim), jnp.float32)

    # Deterministic synthetic parameters (shapes follow BCNet/FCNet __init__).
    vw = _weight_norm(0.1 * jax.random.normal(keys[2], (x_dim, h3), jnp.float32))
    vb = 0.1 * jax.random.normal(keys[3], (1, h3), jnp.float32)
    qw = _weight_norm(0.1 * jax.random.normal(keys[4], (y_dim, h3), jnp.float32))
    qb = 0.1 * jax.random.normal(keys[5], (1, h3), jnp.float32)
    h_mat = _weight_norm(0.1 * jax.random.normal(keys[6], (glimpse, h3), jnp.float32))
    h_bias = jax.random.normal(keys[7], (glimpse, 1), jnp.float32)

    params = (vw, vb, qw, qb, h_mat, h_bias)
    p, logits = biattention_forward(q1, q2, params, glimpse=glimpse, v_mask=True)
    jax.block_until_ready((p, logits))

    # Pure-JAX f32 reference (same math as the PyTorch module at inference).
    v_feat = jax.nn.relu(q1 @ vw + vb)
    q_feat = jax.nn.relu(q2 @ qw + qb)
    ref_logits = jnp.einsum('bkd,gd,bqd->bgkq', v_feat, h_mat, q_feat)
    ref_logits = ref_logits + h_bias[None, :, :, None]
    mask = (jnp.abs(q1).sum(2) == 0)[:, None, :, None]
    ref_logits = jnp.where(mask, -jnp.inf, ref_logits)
    ref_p = jax.nn.softmax(ref_logits.reshape(B, glimpse, K * Q),
                           axis=2).reshape(B, glimpse, K, Q)

    # bf16 MXU operands + approx reciprocal -> tolerances looser than pure f32.
    finite = jnp.isfinite(ref_logits)
    assert bool(jnp.all(jnp.isneginf(logits) == jnp.isneginf(ref_logits)))
    assert jnp.allclose(jnp.where(finite, logits, 0.0),
                        jnp.where(finite, ref_logits, 0.0),
                        atol=0.15, rtol=0.05)
    assert jnp.allclose(p, ref_p, atol=0.03, rtol=0.05)
    print("KERNEL_OK")
</pallas_src>

<mosaic_0001>
module attributes {stable_mosaic.version = 11 : i64} {
  func.func @_biattention_kernel(%arg0: i32, %arg1: memref<4x16x128xbf16, #tpu.memory_space<vmem>>, %arg2: memref<4x8x128xbf16, #tpu.memory_space<vmem>>, %arg3: memref<128x384xbf16, #tpu.memory_space<vmem>>, %arg4: memref<1x384xf32, #tpu.memory_space<vmem>>, %arg5: memref<128x384xbf16, #tpu.memory_space<vmem>>, %arg6: memref<1x384xf32, #tpu.memory_space<vmem>>, %arg7: memref<2x384xbf16, #tpu.memory_space<vmem>>, %arg8: memref<2x1xf32, #tpu.memory_space<smem>>, %arg9: memref<4x2x128xf32, #tpu.memory_space<vmem>>, %arg10: memref<4x2x128xf32, #tpu.memory_space<vmem>>) attributes {dimension_semantics = [#tpu.dimension_semantics<parallel>], iteration_bounds = array<i64: 2>, scalar_prefetch = 0 : i64, scratch_operands = 0 : i64, tpu.core_type = #tpu.core_type<tc>, window_params = [{transform_indices = @transform_0, window_bounds = array<i64: 4, 16, 128>}, {transform_indices = @transform_1, window_bounds = array<i64: 4, 8, 128>}, {pipeline_mode = #tpu.pipeline_mode<synchronous>, transform_indices = @transform_2, window_bounds = array<i64: 128, 384>}, {pipeline_mode = #tpu.pipeline_mode<synchronous>, transform_indices = @transform_3, window_bounds = array<i64: 1, 384>}, {pipeline_mode = #tpu.pipeline_mode<synchronous>, transform_indices = @transform_4, window_bounds = array<i64: 128, 384>}, {pipeline_mode = #tpu.pipeline_mode<synchronous>, transform_indices = @transform_5, window_bounds = array<i64: 1, 384>}, {pipeline_mode = #tpu.pipeline_mode<synchronous>, transform_indices = @transform_6, window_bounds = array<i64: 2, 384>}, {transform_indices = @transform_7, window_bounds = array<i64: 2, 1>}, {transform_indices = @transform_8, window_bounds = array<i64: 4, 2, 128>}, {transform_indices = @transform_9, window_bounds = array<i64: 4, 2, 128>}]} {
    %c0 = arith.constant 0 : index
    %c0_0 = arith.constant 0 : index
    %c0_1 = arith.constant 0 : index
    %0 = vector.load %arg1[%c0, %c0_0, %c0_1] : memref<4x16x128xbf16, #tpu.memory_space<vmem>>, vector<4x16x128xbf16>
    %c0_2 = arith.constant 0 : index
    %c0_3 = arith.constant 0 : index
    %c0_4 = arith.constant 0 : index
    %1 = vector.load %arg2[%c0_2, %c0_3, %c0_4] : memref<4x8x128xbf16, #tpu.memory_space<vmem>>, vector<4x8x128xbf16>
    %2 = vector.shape_cast %0 : vector<4x16x128xbf16> to vector<64x128xbf16>
    %c0_5 = arith.constant 0 : index
    %c0_6 = arith.constant 0 : index
    %3 = vector.load %arg3[%c0_5, %c0_6] : memref<128x384xbf16, #tpu.memory_space<vmem>>, vector<128x384xbf16>
    %cst = arith.constant dense<0.000000e+00> : vector<64x384xf32>
    %4 = tpu.matmul %2, %3, %cst {dimension_numbers = #tpu.dot_dimension_numbers<[1], [0], [0], [1], [0, 0, 1, 1], [], []>} : vector<64x128xbf16>, vector<128x384xbf16>, vector<64x384xf32> -> vector<64x384xf32>
    %c0_7 = arith.constant 0 : index
    %c0_8 = arith.constant 0 : index
    %5 = vector.load %arg4[%c0_7, %c0_8] : memref<1x384xf32, #tpu.memory_space<vmem>>, vector<1x384xf32>
    %6 = vector.broadcast %5 : vector<1x384xf32> to vector<64x384xf32>
    %7 = arith.addf %4, %6 : vector<64x384xf32>
    %cst_9 = arith.constant 0.000000e+00 : f32
    %8 = vector.broadcast %cst_9 : f32 to vector<64x384xf32>
    %9 = arith.maximumf %7, %8 : vector<64x384xf32>
    %10 = vector.shape_cast %1 : vector<4x8x128xbf16> to vector<32x128xbf16>
    %c0_10 = arith.constant 0 : index
    %c0_11 = arith.constant 0 : index
    %11 = vector.load %arg5[%c0_10, %c0_11] : memref<128x384xbf16, #tpu.memory_space<vmem>>, vector<128x384xbf16>
    %cst_12 = arith.constant dense<0.000000e+00> : vector<32x384xf32>
    %12 = tpu.matmul %10, %11, %cst_12 {dimension_numbers = #tpu.dot_dimension_numbers<[1], [0], [0], [1], [0, 0, 1, 1], [], []>} : vector<32x128xbf16>, vector<128x384xbf16>, vector<32x384xf32> -> vector<32x384xf32>
    %c0_13 = arith.constant 0 : index
    %c0_14 = arith.constant 0 : index
    %13 = vector.load %arg6[%c0_13, %c0_14] : memref<1x384xf32, #tpu.memory_space<vmem>>, vector<1x384xf32>
    %14 = vector.broadcast %13 : vector<1x384xf32> to vector<32x384xf32>
    %15 = arith.addf %12, %14 : vector<32x384xf32>
    %cst_15 = arith.constant 0.000000e+00 : f32
    %16 = vector.broadcast %cst_15 : f32 to vector<32x384xf32>
    %17 = arith.maximumf %15, %16 : vector<32x384xf32>
    %18 = vector.shape_cast %9 : vector<64x384xf32> to vector<4x16x384xf32>
    %19 = vector.shape_cast %17 : vector<32x384xf32> to vector<4x8x384xf32>
    %c0_16 = arith.constant 0 : index
    %c0_17 = arith.constant 0 : index
    %20 = vector.load %arg7[%c0_16, %c0_17] : memref<2x384xbf16, #tpu.memory_space<vmem>>, vector<1x384xbf16>
    %21 = arith.extf %20 : vector<1x384xbf16> to vector<1x384xf32>
    %22 = vector.shape_cast %21 : vector<1x384xf32> to vector<1x1x384xf32>
    %23 = vector.broadcast %22 : vector<1x1x384xf32> to vector<4x16x384xf32>
    %24 = arith.mulf %18, %23 : vector<4x16x384xf32>
    %c1 = arith.constant 1 : index
    %c0_18 = arith.constant 0 : index
    %25 = vector.load %arg7[%c1, %c0_18] : memref<2x384xbf16, #tpu.memory_space<vmem>>, vector<1x384xbf16>
    %26 = arith.extf %25 : vector<1x384xbf16> to vector<1x384xf32>
    %27 = vector.shape_cast %26 : vector<1x384xf32> to vector<1x1x384xf32>
    %28 = vector.broadcast %27 : vector<1x1x384xf32> to vector<4x16x384xf32>
    %29 = arith.mulf %18, %28 : vector<4x16x384xf32>
    %30 = tpu.concatenate %24, %29 in 1 : vector<4x16x384xf32>, vector<4x16x384xf32> -> vector<4x32x384xf32>
    %31 = arith.truncf %30 : vector<4x32x384xf32> to vector<4x32x384xbf16>
    %32 = arith.truncf %19 : vector<4x8x384xf32> to vector<4x8x384xbf16>
    "tpu.trace_start"() <{level = 10 : i32, message = "bjd,bqd->bjq"}> : () -> ()
    %cst_19 = arith.constant dense<0.000000e+00> : vector<4x32x8xf32>
    %33 = tpu.matmul %31, %32, %cst_19 {dimension_numbers = #tpu.dot_dimension_numbers<[2], [2], [1], [1], [0, 0, 0, 1, 1, 1], [0], [0]>} : vector<4x32x384xbf16>, vector<4x8x384xbf16>, vector<4x32x8xf32> -> vector<4x32x8xf32>
    "tpu.trace_stop"() : () -> ()
    %c0_20 = arith.constant 0 : index
    %c0_21 = arith.constant 0 : index
    %34 = memref.load %arg8[%c0_20, %c0_21] : memref<2x1xf32, #tpu.memory_space<smem>>
    %35 = vector.broadcast %34 : f32 to vector<16x1xf32>
    %c1_22 = arith.constant 1 : index
    %c0_23 = arith.constant 0 : index
    %36 = memref.load %arg8[%c1_22, %c0_23] : memref<2x1xf32, #tpu.memory_space<smem>>
    %37 = vector.broadcast %36 : f32 to vector<16x1xf32>
    %38 = tpu.concatenate %35, %37 in 0 : vector<16x1xf32>, vector<16x1xf32> -> vector<32x1xf32>
    %39 = vector.shape_cast %38 : vector<32x1xf32> to vector<1x32x1xf32>
    %40 = vector.broadcast %39 : vector<1x32x1xf32> to vector<4x32x8xf32>
    %41 = arith.addf %33, %40 : vector<4x32x8xf32>
    %42 = math.absf %0 : vector<4x16x128xbf16>
    %43 = arith.extf %42 : vector<4x16x128xbf16> to vector<4x16x128xf32>
    %cst_24 = arith.constant dense<0.000000e+00> : vector<4x16xf32>
    %44 = vector.multi_reduction <add>, %43, %cst_24 [2] : vector<4x16x128xf32> to vector<4x16xf32>
    %45 = vector.shape_cast %44 : vector<4x16xf32> to vector<4x16x1xf32>
    %cst_25 = arith.constant 0.000000e+00 : f32
    %46 = vector.broadcast %cst_25 : f32 to vector<4x16x1xf32>
    %47 = arith.cmpf oeq, %45, %46 : vector<4x16x1xf32>
    %cst_26 = arith.constant 0xFF800000 : f32
    %cst_27 = arith.constant 0.000000e+00 : f32
    %48 = vector.broadcast %cst_26 : f32 to vector<4x16x1xf32>
    %49 = vector.broadcast %cst_27 : f32 to vector<4x16x1xf32>
    %50 = arith.select %47, %48, %49 : vector<4x16x1xi1>, vector<4x16x1xf32>
    %51 = tpu.concatenate %50, %50 in 1 : vector<4x16x1xf32>, vector<4x16x1xf32> -> vector<4x32x1xf32>
    %52 = vector.broadcast %51 : vector<4x32x1xf32> to vector<4x32x8xf32>
    %53 = arith.addf %41, %52 : vector<4x32x8xf32>
    %54 = vector.shape_cast %53 : vector<4x32x8xf32> to vector<4x2x128xf32>
    %cst_28 = arith.constant dense<0xFF800000> : vector<4x2xf32>
    %55 = vector.multi_reduction <maximumf>, %54, %cst_28 [2] : vector<4x2x128xf32> to vector<4x2xf32>
    %56 = vector.shape_cast %55 : vector<4x2xf32> to vector<4x2x1xf32>
    %57 = vector.broadcast %56 : vector<4x2x1xf32> to vector<4x2x128xf32>
    %58 = arith.subf %54, %57 : vector<4x2x128xf32>
    %59 = math.exp %58 : vector<4x2x128xf32>
    %cst_29 = arith.constant dense<0.000000e+00> : vector<4x2xf32>
    %60 = vector.multi_reduction <add>, %59, %cst_29 [2] : vector<4x2x128xf32> to vector<4x2xf32>
    %61 = vector.shape_cast %60 : vector<4x2xf32> to vector<4x2x1xf32>
    %62 = tpu.reciprocal %61 {approx = true} : vector<4x2x1xf32> -> vector<4x2x1xf32>
    %63 = vector.broadcast %62 : vector<4x2x1xf32> to vector<4x2x128xf32>
    %64 = arith.mulf %59, %63 : vector<4x2x128xf32>
    %c0_30 = arith.constant 0 : index
    %c0_31 = arith.constant 0 : index
    %c0_32 = arith.constant 0 : index
    %65 = vector.load %arg9[%c0_30, %c0_31, %c0_32] : memref<4x2x128xf32, #tpu.memory_space<vmem>>, vector<4x2x128xf32>
    tpu.vector_store %arg9[%c0_30, %c0_31, %c0_32], %64 {strides = array<i32>} : memref<4x2x128xf32, #tpu.memory_space<vmem>>, vector<4x2x128xf32>,
    %c0_33 = arith.constant 0 : index
    %c0_34 = arith.constant 0 : index
    %c0_35 = arith.constant 0 : index
    %66 = vector.load %arg10[%c0_33, %c0_34, %c0_35] : memref<4x2x128xf32, #tpu.memory_space<vmem>>, vector<4x2x128xf32>
    tpu.vector_store %arg10[%c0_33, %c0_34, %c0_35], %54 {strides = array<i32>} : memref<4x2x128xf32, #tpu.memory_space<vmem>>, vector<4x2x128xf32>,
    return
  }
  func.func @transform_0(%arg0: i32) -> (i32, i32, i32) {
    %c0_i32 = arith.constant 0 : i32
    %c0_i32_0 = arith.constant 0 : i32
    %c0_i32_1 = arith.constant 0 : i32
    return %arg0, %c0_i32, %c0_i32_0 : i32, i32, i32
  }
  func.func @transform_1(%arg0: i32) -> (i32, i32, i32) {
    %c0_i32 = arith.constant 0 : i32
    %c0_i32_0 = arith.constant 0 : i32
    %c0_i32_1 = arith.constant 0 : i32
    return %arg0, %c0_i32, %c0_i32_0 : i32, i32, i32
  }
  func.func @transform_2(%arg0: i32) -> (i32, i32) {
    %c0_i32 = arith.constant 0 : i32
    %c0_i32_0 = arith.constant 0 : i32
    %c0_i32_1 = arith.constant 0 : i32
    return %c0_i32, %c0_i32_0 : i32, i32
  }
  func.func @transform_3(%arg0: i32) -> (i32, i32) {
    %c0_i32 = arith.constant 0 : i32
    %c0_i32_0 = arith.constant 0 : i32
    %c0_i32_1 = arith.constant 0 : i32
    return %c0_i32, %c0_i32_0 : i32, i32
  }
  func.func @transform_4(%arg0: i32) -> (i32, i32) {
    %c0_i32 = arith.constant 0 : i32
    %c0_i32_0 = arith.constant 0 : i32
    %c0_i32_1 = arith.constant 0 : i32
    return %c0_i32, %c0_i32_0 : i32, i32
  }
  func.func @transform_5(%arg0: i32) -> (i32, i32) {
    %c0_i32 = arith.constant 0 : i32
    %c0_i32_0 = arith.constant 0 : i32
    %c0_i32_1 = arith.constant 0 : i32
    return %c0_i32, %c0_i32_0 : i32, i32
  }
  func.func @transform_6(%arg0: i32) -> (i32, i32) {
    %c0_i32 = arith.constant 0 : i32
    %c0_i32_0 = arith.constant 0 : i32
    %c0_i32_1 = arith.constant 0 : i32
    return %c0_i32, %c0_i32_0 : i32, i32
  }
  func.func @transform_7(%arg0: i32) -> (i32, i32) {
    %c0_i32 = arith.constant 0 : i32
    %c0_i32_0 = arith.constant 0 : i32
    %c0_i32_1 = arith.constant 0 : i32
    return %c0_i32, %c0_i32_0 : i32, i32
  }
  func.func @transform_8(%arg0: i32) -> (i32, i32, i32) {
    %c0_i32 = arith.constant 0 : i32
    %c0_i32_0 = arith.constant 0 : i32
    %c0_i32_1 = arith.constant 0 : i32
    return %arg0, %c0_i32, %c0_i32_0 : i32, i32, i32
  }
  func.func @transform_9(%arg0: i32) -> (i32, i32, i32) {
    %c0_i32 = arith.constant 0 : i32
    %c0_i32_0 = arith.constant 0 : i32
    %c0_i32_1 = arith.constant 0 : i32
    return %arg0, %c0_i32, %c0_i32_0 : i32, i32, i32
  }
}

module attributes {stable_mosaic.version = 11 : i64} {
  func.func @_biattention_kernel(%arg0: i32, %arg1: memref<4x16x128xbf16, #tpu.memory_space<vmem>>, %arg2: memref<4x8x128xbf16, #tpu.memory_space<vmem>>, %arg3: memref<128x384xbf16, #tpu.memory_space<vmem>>, %arg4: memref<1x384xf32, #tpu.memory_space<vmem>>, %arg5: memref<128x384xbf16, #tpu.memory_space<vmem>>, %arg6: memref<1x384xf32, #tpu.memory_space<vmem>>, %arg7: memref<2x384xbf16, #tpu.memory_space<vmem>>, %arg8: memref<2x1xf32, #tpu.memory_space<smem>>, %arg9: memref<4x2x16x8xf32, #tpu.memory_space<vmem>>, %arg10: memref<4x2x16x8xf32, #tpu.memory_space<vmem>>) attributes {dimension_semantics = [#tpu.dimension_semantics<parallel>], iteration_bounds = array<i64: 2>, scalar_prefetch = 0 : i64, scratch_operands = 0 : i64, tpu.core_type = #tpu.core_type<tc>, window_params = [{transform_indices = @transform_0, window_bounds = array<i64: 4, 16, 128>}, {transform_indices = @transform_1, window_bounds = array<i64: 4, 8, 128>}, {pipeline_mode = #tpu.pipeline_mode<synchronous>, transform_indices = @transform_2, window_bounds = array<i64: 128, 384>}, {pipeline_mode = #tpu.pipeline_mode<synchronous>, transform_indices = @transform_3, window_bounds = array<i64: 1, 384>}, {pipeline_mode = #tpu.pipeline_mode<synchronous>, transform_indices = @transform_4, window_bounds = array<i64: 128, 384>}, {pipeline_mode = #tpu.pipeline_mode<synchronous>, transform_indices = @transform_5, window_bounds = array<i64: 1, 384>}, {pipeline_mode = #tpu.pipeline_mode<synchronous>, transform_indices = @transform_6, window_bounds = array<i64: 2, 384>}, {transform_indices = @transform_7, window_bounds = array<i64: 2, 1>}, {transform_indices = @transform_8, window_bounds = array<i64: 4, 2, 16, 8>}, {transform_indices = @transform_9, window_bounds = array<i64: 4, 2, 16, 8>}]} {
    %c0 = arith.constant 0 : index
    %c0_0 = arith.constant 0 : index
    %c0_1 = arith.constant 0 : index
    %0 = vector.load %arg1[%c0, %c0_0, %c0_1] : memref<4x16x128xbf16, #tpu.memory_space<vmem>>, vector<4x16x128xbf16>
    %c0_2 = arith.constant 0 : index
    %c0_3 = arith.constant 0 : index
    %c0_4 = arith.constant 0 : index
    %1 = vector.load %arg2[%c0_2, %c0_3, %c0_4] : memref<4x8x128xbf16, #tpu.memory_space<vmem>>, vector<4x8x128xbf16>
    %2 = vector.shape_cast %0 : vector<4x16x128xbf16> to vector<64x128xbf16>
    %c0_5 = arith.constant 0 : index
    %c0_6 = arith.constant 0 : index
    %3 = vector.load %arg3[%c0_5, %c0_6] : memref<128x384xbf16, #tpu.memory_space<vmem>>, vector<128x384xbf16>
    %cst = arith.constant dense<0.000000e+00> : vector<64x384xf32>
    %4 = tpu.matmul %2, %3, %cst {dimension_numbers = #tpu.dot_dimension_numbers<[1], [0], [0], [1], [0, 0, 1, 1], [], []>} : vector<64x128xbf16>, vector<128x384xbf16>, vector<64x384xf32> -> vector<64x384xf32>
    %c0_7 = arith.constant 0 : index
    %c0_8 = arith.constant 0 : index
    %5 = vector.load %arg4[%c0_7, %c0_8] : memref<1x384xf32, #tpu.memory_space<vmem>>, vector<1x384xf32>
    %6 = vector.broadcast %5 : vector<1x384xf32> to vector<64x384xf32>
    %7 = arith.addf %4, %6 : vector<64x384xf32>
    %cst_9 = arith.constant 0.000000e+00 : f32
    %8 = vector.broadcast %cst_9 : f32 to vector<64x384xf32>
    %9 = arith.maximumf %7, %8 : vector<64x384xf32>
    %10 = vector.shape_cast %1 : vector<4x8x128xbf16> to vector<32x128xbf16>
    %c0_10 = arith.constant 0 : index
    %c0_11 = arith.constant 0 : index
    %11 = vector.load %arg5[%c0_10, %c0_11] : memref<128x384xbf16, #tpu.memory_space<vmem>>, vector<128x384xbf16>
    %cst_12 = arith.constant dense<0.000000e+00> : vector<32x384xf32>
    %12 = tpu.matmul %10, %11, %cst_12 {dimension_numbers = #tpu.dot_dimension_numbers<[1], [0], [0], [1], [0, 0, 1, 1], [], []>} : vector<32x128xbf16>, vector<128x384xbf16>, vector<32x384xf32> -> vector<32x384xf32>
    %c0_13 = arith.constant 0 : index
    %c0_14 = arith.constant 0 : index
    %13 = vector.load %arg6[%c0_13, %c0_14] : memref<1x384xf32, #tpu.memory_space<vmem>>, vector<1x384xf32>
    %14 = vector.broadcast %13 : vector<1x384xf32> to vector<32x384xf32>
    %15 = arith.addf %12, %14 : vector<32x384xf32>
    %cst_15 = arith.constant 0.000000e+00 : f32
    %16 = vector.broadcast %cst_15 : f32 to vector<32x384xf32>
    %17 = arith.maximumf %15, %16 : vector<32x384xf32>
    %18 = vector.shape_cast %9 : vector<64x384xf32> to vector<4x16x384xf32>
    %19 = vector.shape_cast %17 : vector<32x384xf32> to vector<4x8x384xf32>
    %c0_16 = arith.constant 0 : index
    %c0_17 = arith.constant 0 : index
    %20 = vector.load %arg7[%c0_16, %c0_17] : memref<2x384xbf16, #tpu.memory_space<vmem>>, vector<1x384xbf16>
    %21 = arith.extf %20 : vector<1x384xbf16> to vector<1x384xf32>
    %22 = vector.shape_cast %21 : vector<1x384xf32> to vector<1x1x384xf32>
    %23 = vector.broadcast %22 : vector<1x1x384xf32> to vector<4x16x384xf32>
    %24 = arith.mulf %18, %23 : vector<4x16x384xf32>
    %c1 = arith.constant 1 : index
    %c0_18 = arith.constant 0 : index
    %25 = vector.load %arg7[%c1, %c0_18] : memref<2x384xbf16, #tpu.memory_space<vmem>>, vector<1x384xbf16>
    %26 = arith.extf %25 : vector<1x384xbf16> to vector<1x384xf32>
    %27 = vector.shape_cast %26 : vector<1x384xf32> to vector<1x1x384xf32>
    %28 = vector.broadcast %27 : vector<1x1x384xf32> to vector<4x16x384xf32>
    %29 = arith.mulf %18, %28 : vector<4x16x384xf32>
    %30 = tpu.concatenate %24, %29 in 1 : vector<4x16x384xf32>, vector<4x16x384xf32> -> vector<4x32x384xf32>
    %31 = arith.truncf %30 : vector<4x32x384xf32> to vector<4x32x384xbf16>
    %32 = arith.truncf %19 : vector<4x8x384xf32> to vector<4x8x384xbf16>
    "tpu.trace_start"() <{level = 10 : i32, message = "bjd,bqd->bjq"}> : () -> ()
    %cst_19 = arith.constant dense<0.000000e+00> : vector<4x32x8xf32>
    %33 = tpu.matmul %31, %32, %cst_19 {dimension_numbers = #tpu.dot_dimension_numbers<[2], [2], [1], [1], [0, 0, 0, 1, 1, 1], [0], [0]>} : vector<4x32x384xbf16>, vector<4x8x384xbf16>, vector<4x32x8xf32> -> vector<4x32x8xf32>
    "tpu.trace_stop"() : () -> ()
    %c0_20 = arith.constant 0 : index
    %c0_21 = arith.constant 0 : index
    %34 = memref.load %arg8[%c0_20, %c0_21] : memref<2x1xf32, #tpu.memory_space<smem>>
    %35 = vector.broadcast %34 : f32 to vector<16x1xf32>
    %c1_22 = arith.constant 1 : index
    %c0_23 = arith.constant 0 : index
    %36 = memref.load %arg8[%c1_22, %c0_23] : memref<2x1xf32, #tpu.memory_space<smem>>
    %37 = vector.broadcast %36 : f32 to vector<16x1xf32>
    %38 = tpu.concatenate %35, %37 in 0 : vector<16x1xf32>, vector<16x1xf32> -> vector<32x1xf32>
    %39 = vector.shape_cast %38 : vector<32x1xf32> to vector<1x32x1xf32>
    %40 = vector.broadcast %39 : vector<1x32x1xf32> to vector<4x32x8xf32>
    %41 = arith.addf %33, %40 : vector<4x32x8xf32>
    %42 = math.absf %0 : vector<4x16x128xbf16>
    %43 = arith.extf %42 : vector<4x16x128xbf16> to vector<4x16x128xf32>
    %cst_24 = arith.constant dense<0.000000e+00> : vector<4x16xf32>
    %44 = vector.multi_reduction <add>, %43, %cst_24 [2] : vector<4x16x128xf32> to vector<4x16xf32>
    %45 = vector.shape_cast %44 : vector<4x16xf32> to vector<4x16x1xf32>
    %cst_25 = arith.constant 0.000000e+00 : f32
    %46 = vector.broadcast %cst_25 : f32 to vector<4x16x1xf32>
    %47 = arith.cmpf oeq, %45, %46 : vector<4x16x1xf32>
    %cst_26 = arith.constant 0xFF800000 : f32
    %cst_27 = arith.constant 0.000000e+00 : f32
    %48 = vector.broadcast %cst_26 : f32 to vector<4x16x1xf32>
    %49 = vector.broadcast %cst_27 : f32 to vector<4x16x1xf32>
    %50 = arith.select %47, %48, %49 : vector<4x16x1xi1>, vector<4x16x1xf32>
    %51 = tpu.concatenate %50, %50 in 1 : vector<4x16x1xf32>, vector<4x16x1xf32> -> vector<4x32x1xf32>
    %52 = vector.broadcast %51 : vector<4x32x1xf32> to vector<4x32x8xf32>
    %53 = arith.addf %41, %52 : vector<4x32x8xf32>
    %54 = vector.shape_cast %53 : vector<4x32x8xf32> to vector<4x2x16x8xf32>
    %cst_28 = arith.constant dense<0xFF800000> : vector<4x2x16xf32>
    %55 = vector.multi_reduction <maximumf>, %54, %cst_28 [3] : vector<4x2x16x8xf32> to vector<4x2x16xf32>
    %56 = vector.shape_cast %55 : vector<4x2x16xf32> to vector<4x2x16x1xf32>
    %cst_29 = arith.constant dense<0xFF800000> : vector<4x2x1xf32>
    %57 = vector.multi_reduction <maximumf>, %56, %cst_29 [2] : vector<4x2x16x1xf32> to vector<4x2x1xf32>
    %58 = vector.shape_cast %57 : vector<4x2x1xf32> to vector<4x2x1x1xf32>
    %59 = vector.broadcast %58 : vector<4x2x1x1xf32> to vector<4x2x16x8xf32>
    %60 = arith.subf %54, %59 : vector<4x2x16x8xf32>
    %61 = math.exp %60 : vector<4x2x16x8xf32>
    %cst_30 = arith.constant dense<0.000000e+00> : vector<4x2x16xf32>
    %62 = vector.multi_reduction <add>, %61, %cst_30 [3] : vector<4x2x16x8xf32> to vector<4x2x16xf32>
    %63 = vector.shape_cast %62 : vector<4x2x16xf32> to vector<4x2x16x1xf32>
    %cst_31 = arith.constant dense<0.000000e+00> : vector<4x2x1xf32>
    %64 = vector.multi_reduction <add>, %63, %cst_31 [2] : vector<4x2x16x1xf32> to vector<4x2x1xf32>
    %65 = vector.shape_cast %64 : vector<4x2x1xf32> to vector<4x2x1x1xf32>
    %66 = tpu.reciprocal %65 {approx = true} : vector<4x2x1x1xf32> -> vector<4x2x1x1xf32>
    %67 = vector.broadcast %66 : vector<4x2x1x1xf32> to vector<4x2x16x8xf32>
    %68 = arith.mulf %61, %67 : vector<4x2x16x8xf32>
    %c0_32 = arith.constant 0 : index
    %c0_33 = arith.constant 0 : index
    %c0_34 = arith.constant 0 : index
    %c0_35 = arith.constant 0 : index
    %69 = vector.load %arg9[%c0_32, %c0_33, %c0_34, %c0_35] : memref<4x2x16x8xf32, #tpu.memory_space<vmem>>, vector<4x2x16x8xf32>
    tpu.vector_store %arg9[%c0_32, %c0_33, %c0_34, %c0_35], %68 {strides = array<i32>} : memref<4x2x16x8xf32, #tpu.memory_space<vmem>>, vector<4x2x16x8xf32>,
    %c0_36 = arith.constant 0 : index
    %c0_37 = arith.constant 0 : index
    %c0_38 = arith.constant 0 : index
    %c0_39 = arith.constant 0 : index
    %70 = vector.load %arg10[%c0_36, %c0_37, %c0_38, %c0_39] : memref<4x2x16x8xf32, #tpu.memory_space<vmem>>, vector<4x2x16x8xf32>
    tpu.vector_store %arg10[%c0_36, %c0_37, %c0_38, %c0_39], %54 {strides = array<i32>} : memref<4x2x16x8xf32, #tpu.memory_space<vmem>>, vector<4x2x16x8xf32>,
    return
  }
  func.func @transform_0(%arg0: i32) -> (i32, i32, i32) {
    %c0_i32 = arith.constant 0 : i32
    %c0_i32_0 = arith.constant 0 : i32
    %c0_i32_1 = arith.constant 0 : i32
    return %arg0, %c0_i32, %c0_i32_0 : i32, i32, i32
  }
  func.func @transform_1(%arg0: i32) -> (i32, i32, i32) {
    %c0_i32 = arith.constant 0 : i32
    %c0_i32_0 = arith.constant 0 : i32
    %c0_i32_1 = arith.constant 0 : i32
    return %arg0, %c0_i32, %c0_i32_0 : i32, i32, i32
  }
  func.func @transform_2(%arg0: i32) -> (i32, i32) {
    %c0_i32 = arith.constant 0 : i32
    %c0_i32_0 = arith.constant 0 : i32
    %c0_i32_1 = arith.constant 0 : i32
    return %c0_i32, %c0_i32_0 : i32, i32
  }
  func.func @transform_3(%arg0: i32) -> (i32, i32) {
    %c0_i32 = arith.constant 0 : i32
    %c0_i32_0 = arith.constant 0 : i32
    %c0_i32_1 = arith.constant 0 : i32
    return %c0_i32, %c0_i32_0 : i32, i32
  }
  func.func @transform_4(%arg0: i32) -> (i32, i32) {
    %c0_i32 = arith.constant 0 : i32
    %c0_i32_0 = arith.constant 0 : i32
    %c0_i32_1 = arith.constant 0 : i32
    return %c0_i32, %c0_i32_0 : i32, i32
  }
  func.func @transform_5(%arg0: i32) -> (i32, i32) {
    %c0_i32 = arith.constant 0 : i32
    %c0_i32_0 = arith.constant 0 : i32
    %c0_i32_1 = arith.constant 0 : i32
    return %c0_i32, %c0_i32_0 : i32, i32
  }
  func.func @transform_6(%arg0: i32) -> (i32, i32) {
    %c0_i32 = arith.constant 0 : i32
    %c0_i32_0 = arith.constant 0 : i32
    %c0_i32_1 = arith.constant 0 : i32
    return %c0_i32, %c0_i32_0 : i32, i32
  }
  func.func @transform_7(%arg0: i32) -> (i32, i32) {
    %c0_i32 = arith.constant 0 : i32
    %c0_i32_0 = arith.constant 0 : i32
    %c0_i32_1 = arith.constant 0 : i32
    return %c0_i32, %c0_i32_0 : i32, i32
  }
  func.func @transform_8(%arg0: i32) -> (i32, i32, i32, i32) {
    %c0_i32 = arith.constant 0 : i32
    %c0_i32_0 = arith.constant 0 : i32
    %c0_i32_1 = arith.constant 0 : i32
    %c0_i32_2 = arith.constant 0 : i32
    return %arg0, %c0_i32, %c0_i32_0, %c0_i32_1 : i32, i32, i32, i32
  }
  func.func @transform_9(%arg0: i32) -> (i32, i32, i32, i32) {
    %c0_i32 = arith.constant 0 : i32
    %c0_i32_0 = arith.constant 0 : i32
    %c0_i32_1 = arith.constant 0 : i32
    %c0_i32_2 = arith.constant 0 : i32
    return %arg0, %c0_i32, %c0_i32_0, %c0_i32_1 : i32, i32, i32, i32
  }
}

</mosaic_0001>

<bundles_post_ra>
// kernel: tpu_custom_call.1
= control target key start
LH: loop header
LB: loop body
LE: loop exit
PB: predicated region body
PF: predicated region fallthrough
CT: control target
= control target key end

     0   :  { %s3814_s0 = inlined_call_operand.hbm [shape: bf16[8,16,128], index: 0, kind: input, shape index: {}]   ;;  %s3815_s1 = inlined_call_operand.hbm [shape: bf16[8,8,128], index: 1, kind: input, shape index: {}]   ;;  %s3816_s2 = inlined_call_operand.hbm [shape: bf16[128,384], index: 2, kind: input, shape index: {}]   ;;  %s3817_s3 = inlined_call_operand.vmem [shape: f32[1,384], index: 3, kind: input, shape index: {}]   ;;  %s3818_s4 = inlined_call_operand.hbm [shape: bf16[128,384], index: 4, kind: input, shape index: {}]   ;;  %s3819_s5 = inlined_call_operand.vmem [shape: f32[1,384], index: 5, kind: input, shape index: {}]   ;;  %s3820_s6 = inlined_call_operand.vmem [shape: bf16[2,384], index: 6, kind: input, shape index: {}]   ;;  %s3821_s7 = inlined_call_operand.vmem [shape: f32[2,1], index: 7, kind: input, shape index: {}]   ;;  %s3822_s8 = inlined_call_operand.vmem [shape: f32[8,2,16,8], index: 8, kind: output, shape index: {0}]   ;;  %s3823_s9 = inlined_call_operand.vmem [shape: f32[8,2,16,8], index: 9, kind: output, shape index: {1}]  }
   0x1   :  { %3837 = sst [smem:[#allocation25_spill]] %s3814_s0 }
   0x2   :  { %3838 = sst [smem:[#allocation26_spill]] %s3816_s2 }
   0x3   :  { %3839 = sst [smem:[#allocation27_spill]] %s3818_s4 }
   0x4   :  { %3840 = sst [smem:[#allocation28_spill]] %s3821_s7 }
   0x5   :  { %15 = vsyncpa [#allocation3], 0 }
   0x6   :  { %17 = vsyncpa [#allocation3 + $0x1], 0 }
   0x7   :  { %18 = vsyncpa [#allocation6], 0 }
   0x8   :  { %20 = vsyncpa [#allocation6 + $0x1], 0 }
   0x9   :  { %21 = vsyncpa [#allocation9], 0 }
   0xa   :  { %22 = vsyncpa [#allocation4], 0  ;;  %s2915_s30 = smov 0   ;;  %s2917_s10 = smov 0  }
   0xb   :  { %s2919_s11 = smov 0   ;;  %s2921_s12 = smov 0  }
   0xc LB: > { %s2934_s13 = sadd.s32 4294967295, %s2852_s12   ;;  %p48_p0 = scmp.ne.s32.totalorder %s2844_s10, %s2840_s30  ;;  %s2852_s12 = sphi %s2921_s12, %s3902_s12   ;;  %s2848_s11 = sphi %s2919_s11, %s3901_s11   ;;  %s2844_s10 = sphi %s2917_s10, %s3900_s10   ;;  %s2840_s30 = sphi %s2915_s30, %s3899_s30  }
   0xd   : > { %p3824_p1 = scmp.eq.s32.totalorder %s2934_s13, 0  ;;  %p2262_p2 = scmp.ge.s32.totalorder %s2852_s12, 1 }
   0xe   : > { %p263_p3 = scmp.lt.s32.totalorder %s2852_s12, 3  ;;  %s2854_s16 = smov [#allocation7]  }
   0xf   : > { %p2942_p4 = por %p3824_p1, %p48_p0  ;;  %s275_s17 = sshll.u32 %s2854_s16, 4  ;;  %s2950_s17 = int_to_ptr.vmem [resolvable:$true] %s275_s17 }
  0x10   : > { %p2946_p5 = pnand %p2262_p2, %p263_p3  ;;  %s2855_s19 = smov [#allocation8]  }
  0x11   : > { %s3841_s14 = scalar_select %p2942_p4, 1, 0 }
  0x12   : > { %p2466_p6 = pneg %p2946_p5  ;;  %s291_s20 = sshll.u32 %s2855_s19, 4  ;;  %s2960_s20 = int_to_ptr.vmem [resolvable:$true] %s291_s20 }
  0x13   : > { %s3844_s7 = sld [smem:[#allocation28_spill]]  ;;  %s3845_s2 = sld [smem:[#allocation26_spill]] }
  0x14   : > { %p2956_p7 = pnand %p2466_p6, %p3824_p1 }
  0x16   : > { %p2975_p9 = pneg %p2956_p7 }
  0x19   : > { %s311_s23 = sshll.u32 %s3844_s7, 4  ;;  %s2671_s26 = scalar_lea.hbm %s3845_s2, 3072  ;;  %s2965_s23 = int_to_ptr.vmem [resolvable:$true] %s311_s23 }
  0x1a   : > { %p2672_p8 = scmp.ne.s32.totalorder %s3845_s2, %s2671_s26  ;;  %p2678_p12 = scmp.lt.u32.totalorder %s2671_s26, %s3845_s2 }
  0x1c   : > { %p2674_p10 = pnand %p2975_p9, %p2672_p8 }
  0x1e   : > { %p2675_p11 = pneg %p2674_p10 }
  0x20   : > { %p2680_p13 = pnand %p2678_p12, %p2675_p11 }
  0x22   : > { %2683 = shalt.err (!%p2680_p13)
}
  0x23   : > { %s2684_s19 = scalar_lea.vmem %s2950_s17, 3072  ;;  %p2692_p6 = scmp.lt.s32.totalorder %s2950_s17, %s2950_s17 }
  0x24   : > { %p2685_p0 = scmp.ne.s32.totalorder %s2950_s17, %s2684_s19  ;;  %p2693_p1 = scmp.lt.s32.totalorder %s2684_s19, %s2684_s19 }
  0x26   : > { %p2687_p2 = pnand %p2685_p0, %p2975_p9  ;;  %p2694_p8 = por %p2693_p1, %p2692_p6 }
  0x28   : > { %p2688_p3 = pneg %p2687_p2 }
  0x2a   : > { %p2695_p10 = pnand %p2694_p8, %p2688_p3 }
  0x2c   : > { %2698 = shalt.err (!%p2695_p10)
}
  0x2d   : > { %s2856_s21 = smov 192   ;;  %s2857_s22 = smov 12  }
  0x2e   : > { %2469 = dma.hbm_to_vmem [thread:$0]  (!%p2956_p7), %s3845_s2, 3072, %s2950_s17, [#allocation6], %s2856_s21, %s2856_s21, %s2857_s22  }
  0x2f   : > { %s3847_s4 = sld [smem:[#allocation27_spill]] }
  0x35   : > { %s2699_s28 = scalar_lea.hbm %s3847_s4, 3072 }
  0x36   : > { %p2700_p1 = scmp.ne.s32.totalorder %s3847_s4, %s2699_s28  ;;  %p2706_p13 = scmp.lt.u32.totalorder %s2699_s28, %s3847_s4 }
  0x38   : > { %p2702_p11 = pnand %p2700_p1, %p2975_p9 }
  0x3a   : > { %p2703_p12 = pneg %p2702_p11 }
  0x3c   : > { %p2708_p0 = pnand %p2706_p13, %p2703_p12 }
  0x3e   : > { %2711 = shalt.err (!%p2708_p0)
}
  0x3f   : > { %s2712_s17 = scalar_lea.vmem %s2960_s20, 3072  ;;  %p2720_p8 = scmp.lt.s32.totalorder %s2960_s20, %s2960_s20 }
  0x40   : > { %p2713_p2 = scmp.ne.s32.totalorder %s2960_s20, %s2712_s17  ;;  %p2721_p10 = scmp.lt.s32.totalorder %s2712_s17, %s2712_s17 }
  0x42   : > { %p2715_p3 = pnand %p2713_p2, %p2975_p9  ;;  %p2722_p1 = por %p2721_p10, %p2720_p8 }
  0x44   : > { %p2716_p6 = pneg %p2715_p3 }
  0x46   : > { %p2723_p11 = pnand %p2722_p1, %p2716_p6 }
  0x48   : > { %2726 = shalt.err (!%p2723_p11)
}
  0x49   : > { %2472 = dma.hbm_to_vmem [thread:$0]  (!%p2956_p7), %s3847_s4, 3072, %s2960_s20, [#allocation9], %s2856_s21, %s2856_s21, %s2857_s22  }
  0x4a   : > { %s2727_s25 = scalar_lea.vmem %s2965_s23, 32  ;;  %p2735_p2 = scmp.lt.s32.totalorder %s2965_s23, %s2965_s23 }
  0x4b   : > { %p2728_p12 = scmp.ne.s32.totalorder %s2965_s23, %s2727_s25  ;;  %p2736_p3 = scmp.lt.s32.totalorder %s2727_s25, %s2727_s25 }
  0x4d   : > { %p2730_p13 = pnand %p2728_p12, %p2975_p9  ;;  %p2737_p6 = por %p2736_p3, %p2735_p2 }
  0x4f   : > { %p2731_p0 = pneg %p2730_p13 }
  0x51   : > { %p2738_p8 = pnand %p2737_p6, %p2731_p0 }
  0x53   : > { %2741 = shalt.err (!%p2738_p8)
}
  0x54   : > { %s2858_s26 = smov [#allocation10]   ;;  %s3029_s20 = sadd.s32 1, %s2852_s12  }
  0x55   : > { %2475 = dma.vmem_to_smem (!%p2956_p7), %s2965_s23, 32, %s2858_s26, [#allocation4]  }
  0x56   : > { %s32_s29 = ssub.s32 %s2852_s12, %s3029_s20  ;;  %s35_s21 = sadd.s32 1, %s2848_s11 }
  0x57   : > { %p33_p9 = scmp.eq.s32.totalorder %s32_s29, 0  ;;  %p42_p10 = scmp.ne.s32.totalorder %s2848_s11, %s2844_s10 }
  0x58   : > { %p43_p1 = scmp.eq.s32.totalorder %s2852_s12, 0  ;;  %p2486_p11 = scmp.lt.s32.totalorder %s2852_s12, 2 }
  0x59   : > { %s3039_s18 = scalar_select %p33_p9, %s2848_s11, %s35_s21  }
  0x5a   : > { %p44_p12 = por %p43_p1, %p42_p10  ;;  %s3042_s22 = sand.u32 1, %s2848_s11  }
  0x5b   : > { %s2267_s27 = sshll.u32 %s3042_s22, 5  ;;  %s2344_s28 = sshll.u32 %s2852_s12, 9 }
  0x5c   : > { %s3848_s0 = sld [smem:[#allocation25_spill]]  ;;  %s326_s19 = scalar_lea.vmem [#allocation2], %s2267_s27 }
  0x5d   : > { %s334_s17 = sshll.u32 %s326_s19, 4  ;;  %p3053_p7 = pnand %p2486_p11, %p44_p12  ;;  %s3051_s17 = int_to_ptr.vmem [resolvable:$true] %s334_s17 }
  0x5e   : > { %s323_s25 = scalar_lea.sflag [#allocation3], %s3042_s22 }
  0x5f   : > { %p2744_p0 = pneg %p3053_p7 }
  0x62   : > { %s3049_s16 = scalar_lea.hbm %s3848_s0, %s2344_s28  ;;  %s2747_s27 = scalar_lea.hbm %s3848_s0, 1024 }
  0x63   : > { %s2742_s26 = scalar_lea.hbm %s3049_s16, 512  ;;  %p2748_p6 = scmp.lt.u32.totalorder %s3049_s16, %s3848_s0 }
  0x64   : > { %p2743_p13 = scmp.ne.s32.totalorder %s3049_s16, %s2742_s26  ;;  %p2749_p8 = scmp.lt.u32.totalorder %s2747_s27, %s2742_s26 }
  0x65   : > { %p2751_p10 = scmp.lt.u32.totalorder %s2742_s26, %s3049_s16 }
  0x66   : > { %p2745_p2 = pnand %p2744_p0, %p2743_p13  ;;  %p2750_p9 = por %p2749_p8, %p2748_p6 }
  0x68   : > { %p2746_p3 = pneg %p2745_p2  ;;  %p2752_p1 = por %p2751_p10, %p2750_p9 }
  0x6a   : > { %p2753_p11 = pnand %p2752_p1, %p2746_p3 }
  0x6c   : > { %2756 = shalt.err (!%p2753_p11)
}
  0x6d   : > { %s2757_s30 = scalar_lea.vmem %s3051_s17, 512  ;;  %s2859_s19 = smov [#allocation2]  }
  0x6e   : > { %p2758_p12 = scmp.ne.s32.totalorder %s3051_s17, %s2757_s30  ;;  %s2762_s29 = sshll.u32 %s2859_s19, 4  ;;  %s2763_s29 = int_to_ptr.vmem [resolvable:$false] %s2762_s29 }
  0x6f   : > { %s2764_s21 = scalar_lea.vmem %s2763_s29, 1024  ;;  %p2765_p4 = scmp.lt.s32.totalorder %s3051_s17, %s2763_s29 }
  0x70   : > { %p2760_p13 = pnand %p2758_p12, %p2744_p0  ;;  %p2766_p6 = scmp.lt.s32.totalorder %s2764_s21, %s2757_s30 }
  0x72   : > { %p2761_p2 = pneg %p2760_p13  ;;  %p2767_p8 = por %p2766_p6, %p2765_p4 }
  0x74   : > { %p2768_p9 = pnand %p2767_p8, %p2761_p2 }
  0x76   : > { %2771 = shalt.err (!%p2768_p9)
}
  0x77   : > { %s2860_s26 = smov 64   ;;  %s2861_s27 = smov 4  }
  0x78   : > { %2479 = dma.hbm_to_vmem [thread:$0]  (!%p3053_p7), %s3049_s16, 512, %s3051_s17, %s323_s25, %s2860_s26, %s2860_s26, %s2861_s27  }
  0x79   : > { %s2271_s28 = sshll.u32 %s3042_s22, 4  ;;  %s2345_s23 = sshll.u32 %s2852_s12, 8 }
  0x7a   : > { %s3094_s29 = scalar_lea.hbm %s3815_s1, %s2345_s23  ;;  %s348_s21 = scalar_lea.vmem [#allocation5], %s2271_s28 }
  0x7b   : > { %s355_s24 = sshll.u32 %s348_s21, 4  ;;  %s3850_s0 = sand.u32 1, %s2852_s12   ;;  %s3096_s24 = int_to_ptr.vmem [resolvable:$true] %s355_s24 }
  0x7c   : > { %s3100_s2 = scalar_lea.sflag [#allocation6], %s3850_s0  ;;  %s2772_s4 = scalar_lea.hbm %s3094_s29, 256 }
  0x7d   : > { %p2773_p4 = scmp.ne.s32.totalorder %s3094_s29, %s2772_s4  ;;  %s2777_s17 = scalar_lea.hbm %s3815_s1, 512 }
  0x7e   : > { %p2778_p1 = scmp.lt.u32.totalorder %s3094_s29, %s3815_s1  ;;  %p2779_p11 = scmp.lt.u32.totalorder %s2777_s17, %s2772_s4 }
  0x7f   : > { %p2775_p3 = pnand %p2773_p4, %p2744_p0  ;;  %p2781_p13 = scmp.lt.u32.totalorder %s2772_s4, %s3094_s29 }
  0x80   : > { %p2780_p12 = por %p2779_p11, %p2778_p1 }
  0x81   : > { %p2776_p10 = pneg %p2775_p3 }
  0x82   : > { %p2782_p2 = por %p2781_p13, %p2780_p12 }
  0x84   : > { %p2783_p6 = pnand %p2782_p2, %p2776_p10 }
  0x86   : > { %2786 = shalt.err (!%p2783_p6)
}
  0x87   : > { %s2787_s0 = scalar_lea.vmem %s3096_s24, 256  ;;  %s2862_s12 = smov [#allocation5]  }
  0x88   : > { %p2788_p8 = scmp.ne.s32.totalorder %s3096_s24, %s2787_s0  ;;  %s2792_s28 = sshll.u32 %s2862_s12, 4  ;;  %s2793_s28 = int_to_ptr.vmem [resolvable:$false] %s2792_s28 }
  0x89   : > { %s2794_s30 = scalar_lea.vmem %s2793_s28, 512  ;;  %p2795_p3 = scmp.lt.s32.totalorder %s3096_s24, %s2793_s28 }
  0x8a   : > { %p2790_p9 = pnand %p2788_p8, %p2744_p0  ;;  %p2796_p1 = scmp.lt.s32.totalorder %s2794_s30, %s2787_s0 }
  0x8c   : > { %p2791_p4 = pneg %p2790_p9  ;;  %p2797_p11 = por %p2796_p1, %p2795_p3 }
  0x8e   : > { %p2798_p12 = pnand %p2797_p11, %p2791_p4 }
  0x90   : > { %2801 = shalt.err (!%p2798_p12)
}
  0x91   : > { %2482 = dma.hbm_to_vmem [thread:$0]  (!%p3053_p7), %s3094_s29, 256, %s3096_s24, %s3100_s2, %s2860_s26, %s2860_s26, %s2861_s27  }
  0x92   : > { %367 = sbr.rel (%p2946_p5) target bundleno = 1072 (0x430), region = 52 }
  0x99   : > { %s369_s4 = sand.u32 1, %s2844_s10   ;;  %p3851_p0 = scmp.ne.s32.totalorder %s3841_s14, 0 }
  0x9a   : > { %s2275_s19 = sshll.u32 %s369_s4, 5  ;;  %s370_s21 = scalar_lea.sflag [#allocation3], %s369_s4 }
  0x9b   : > { %s3132_s22 = scalar_lea.vmem [#allocation2], %s2275_s19 }
  0x9c   : > { %2819 = dma.done.wait (%p3851_p0), %s370_s21, 512  }
  0x9d   : > { %2821 = vsyncadd (%p3851_p0), %s370_s21, 4294966784  ;;  %s378_s7 = sand.u32 1, %s2934_s13   ;;  %s2276_s16 = sshll.u32 %s369_s4, 4 }
  0x9e   : > { %s379_s2 = scalar_lea.sflag [#allocation6], %s378_s7  ;;  %s3139_s24 = scalar_lea.vmem [#allocation5], %s2276_s16 }
  0x9f   : > { %2823 = dma.done.wait (%p3851_p0), %s379_s2, 256  }
  0xa0   : > { %2825 = vsyncadd (%p3851_p0), %s379_s2, 4294967040  ;;  %p3852_p5 = scmp.eq.s32.totalorder %s2934_s13, 0 }
  0xa2   : > { %2827 = dma.done.wait (%p3852_p5), [#allocation6], 3072   ;;  %p3853_p7 = pmov %p3852_p5 }
  0xa3   : > { %p3854_p10 = pmov %p3852_p5 }
  0xa4   : > { %2829 = vsyncadd (%p3853_p7), [#allocation6], 4294964224 }
  0xa5   : > { %2831 = dma.done.wait (%p3854_p10), [#allocation9], 3072   ;;  %p3855_p13 = pmov %p3852_p5 }
  0xa6   : > { %p3856_p2 = pmov %p3852_p5 }
  0xa7   : > { %2833 = vsyncadd (%p3855_p13), [#allocation9], 4294964224 }
  0xa8   : > { %2835 = dma.done.wait (%p3856_p2), [#allocation4], 32   ;;  %p3857_p6 = pmov %p3856_p2 }
  0xaa   : > { %2837 = vsyncadd (%p3857_p6), [#allocation4], 4294967264 }
  0xab   : > { %399 = sfence }
  0xac   : > { %v2553_v0 = vld [vmem:[#allocation7 + $0x4] ss:$12 sps:$4 sm:$0xff]   ;;  %v2555_v1 = vld [vmem:[#allocation7 + $0x8] ss:$12 sps:$4 sm:$0xff]   ;;  %v2863_v2 = vmov 0   ;;  %s2340_s14 = sld [smem:[#allocation10 + $0x80]] }
  0xad   : > { %704 = vmatprep.mubr.bf16.mxu0 %v2863_v2  ;;  %2532 = vset.pattern.permute.xlu1 %v2863_v2  ;;  %v2556_v3 = vld [vmem:[#allocation7] ss:$12 sps:$4 sm:$0xff]   ;;  %v2557_v4 = vld [vmem:[#allocation7 + $0x1c] ss:$12 sps:$4 sm:$0xff]   ;;  %v2560_v6 = vld [vmem:[#allocation7 + $0x18] ss:$12 sps:$4 sm:$0xff]  }
  0xae   : > { %672 = vmatprep.subr.bf16.mxu0 %v2553_v0  ;;  %2531 = vset.pattern.permute.xlu0 %v2863_v2  ;;  %v2559_v5 = vld [vmem:[#allocation7 + $0x20] ss:$12 sps:$4 sm:$0xff]   ;;  %v2563_v8 = vld [vmem:[#allocation7 + $0x38] ss:$12 sps:$4 sm:$0xff]   ;;  %v2564_v9 = vld [vmem:[#allocation7 + $0x30] ss:$12 sps:$4 sm:$0xff]  }
  0xaf   : > { %2382 = vmatprep.subr.bf16.mxu1 %v2555_v1  ;;  %673 = vmatpush1.bf16.msra.mxu0 %v2556_v3  ;;  %v2561_v7 = vld [vmem:[#allocation7 + $0x34] ss:$12 sps:$4 sm:$0xff]   ;;  %v2565_v10 = vld [vmem:[#allocation7 + $0x4c] ss:$12 sps:$4 sm:$0xff]   ;;  %v2567_v11 = vld [vmem:[#allocation7 + $0x50] ss:$12 sps:$4 sm:$0xff]  }
  0xb0   : > { %2383 = vmatpush3.bf16.msra.mxu1 %v2555_v1  ;;  %674 = vmatprep.subr.bf16.mxu0 %v2557_v4  ;;  %v2568_v12 = vld [vmem:[#allocation7 + $0x48] ss:$12 sps:$4 sm:$0xff]   ;;  %v2569_v13 = vld [vmem:[#allocation7 + $0x64] ss:$12 sps:$4 sm:$0xff]   ;;  %v2572_v15 = vld [vmem:[#allocation7 + $0x60] ss:$12 sps:$4 sm:$0xff]  }
  0xb1   : > { %2384 = vmatprep.subr.bf16.mxu1 %v2559_v5  ;;  %v2571_v14 = vld [vmem:[#allocation7 + $0x68] ss:$12 sps:$4 sm:$0xff]   ;;  %v2575_v17 = vld [vmem:[#allocation7 + $0x80] ss:$12 sps:$4 sm:$0xff]   ;;  %v2576_v19 = vld [vmem:[#allocation7 + $0x78] ss:$12 sps:$4 sm:$0xff]  }
  0xb2   : > { %v2573_v16 = vld [vmem:[#allocation7 + $0x7c] ss:$12 sps:$4 sm:$0xff]   ;;  %v459_v18 = vld [vmem:[%s3132_s22] sm:$0xf]  ;;  %v460_v20 = vld [vmem:[%s3132_s22 + $0x4] sm:$0xf] }
  0xb3   : > { %675 = vmatpush1.bf16.msra.mxu0 %v2560_v6  ;;  %v2577_v21 = vld [vmem:[#allocation7 + $0x94] ss:$12 sps:$4 sm:$0xff]   ;;  %v2286_v22 = vcombine.low %v459_v18, %v460_v20  ;;  %v1684_v23 = vand.u32 2147450879, %v459_v18  ;;  %v2579_v24 = vld [vmem:[#allocation7 + $0x98] ss:$12 sps:$4 sm:$0xff]  }
  0xb4   : > { %2385 = vmatpush3.bf16.msra.mxu1 %v2559_v5  ;;  %676 = vmatprep.subr.bf16.mxu0 %v2561_v7  ;;  %v1685_v26 = vand.u32 2147450879, %v460_v20  ;;  %v2580_v27 = vld [vmem:[#allocation7 + $0x90] ss:$12 sps:$4 sm:$0xff]   ;;  %v2581_v28 = vld [vmem:[#allocation7 + $0xac] ss:$12 sps:$4 sm:$0xff]  }
  0xb5   : > { %2386 = vmatprep.subr.bf16.mxu1 %v2563_v8  ;;  %2398 = vmatprep.mubr.bf16.mxu1 %v2286_v22  ;;  %v1692_v25 = vunpack.c.l.bf16 %v1684_v23  ;;  %v2583_v29 = vld [vmem:[#allocation7 + $0xb0] ss:$12 sps:$4 sm:$0xff]   ;;  %v461_v30 = vld [vmem:[%s3132_s22 + $0x8] sm:$0xf]  ;;  %v462_v34 = vld [vmem:[%s3132_s22 + $0xc] sm:$0xf] }
  0xb6   : > { %v1693_v31 = vunpack.c.l.bf16 %v1685_v26  ;;  %v2584_v32 = vld [vmem:[#allocation7 + $0xa8] ss:$12 sps:$4 sm:$0xff]   ;;  %v1686_v33 = vand.u32 2147450879, %v461_v30  ;;  %v2589_v35 = vld [vmem:[#allocation8 + $0x4] ss:$12 sps:$4 sm:$0xff]   ;;  %v2287_v39 = vcombine.low %v461_v30, %v462_v34 }
  0xb7   : > { %677 = vmatpush1.bf16.msra.mxu0 %v2564_v9  ;;  %1700 = vadd.xlane.f32.xlu0 %v1692_v25  ;;  %v2590_v36 = vld [vmem:[#allocation8 + $0x8] ss:$12 sps:$4 sm:$0xff]   ;;  %v2587_v38 = vld [vmem:[#allocation8] ss:$12 sps:$4 sm:$0xff]   ;;  %v1687_v41 = vand.u32 2147450879, %v462_v34 }
  0xb8   : > { %2387 = vmatpush3.bf16.msra.mxu1 %v2563_v8  ;;  %678 = vmatprep.subr.bf16.mxu0 %v2565_v10  ;;  %v1694_v37 = vunpack.c.l.bf16 %v1686_v33  ;;  %v2593_v40 = vld [vmem:[#allocation8 + $0x1c] ss:$12 sps:$4 sm:$0xff]   ;;  %v2594_v42 = vld [vmem:[#allocation8 + $0x20] ss:$12 sps:$4 sm:$0xff]   ;;  %v463_v43 = vld [vmem:[%s3132_s22 + $0x10] sm:$0xf]  ;;  %v505_v33 = vlaneseq }
  0xb9   : > { %2388 = vmatprep.subr.bf16.mxu1 %v2567_v11  ;;  %v464_v44 = vld [vmem:[%s3132_s22 + $0x14] sm:$0xf]  ;;  %v2591_v45 = vld [vmem:[#allocation8 + $0x18] ss:$12 sps:$4 sm:$0xff]   ;;  %v1695_v47 = vunpack.c.l.bf16 %v1687_v41  ;;  %v1688_v48 = vand.u32 2147450879, %v463_v43 }
  0xba   : > { %1704 = vadd.xlane.f32.xlu1 %v1694_v37  ;;  %v2597_v46 = vld [vmem:[#allocation8 + $0x34] ss:$12 sps:$4 sm:$0xff]   ;;  %v2288_v49 = vcombine.low %v463_v43, %v464_v44  ;;  %v3167_v50 = vld [vmem:[%s3132_s22 + $0x18] sm:$0xf]  ;;  %v3170_v51 = vld [vmem:[%s3132_s22 + $0x1c] sm:$0xf] }
  0xbb   : > { %679 = vmatpush1.bf16.msra.mxu0 %v2568_v12  ;;  %1702 = vadd.xlane.f32.xlu0 %v1693_v31  ;;  %v2598_v52 = vld [vmem:[#allocation8 + $0x38] ss:$12 sps:$4 sm:$0xff]   ;;  %v1696_v53 = vunpack.c.l.bf16 %v1688_v48  ;;  %v2595_v54 = vld [vmem:[#allocation8 + $0x30] ss:$12 sps:$4 sm:$0xff]   ;;  %v2289_v55 = vcombine.low %v3167_v50, %v3170_v51  ;;  %v1689_v56 = vand.u32 2147450879, %v464_v44 }
  0xbc   : > { %2389 = vmatpush3.bf16.msra.mxu1 %v2567_v11  ;;  %680 = vmatprep.subr.bf16.mxu0 %v2569_v13  ;;  %v2601_v57 = vld [vmem:[#allocation8 + $0x4c] ss:$12 sps:$4 sm:$0xff]   ;;  %v2602_v58 = vld [vmem:[#allocation8 + $0x50] ss:$12 sps:$4 sm:$0xff]   ;;  %v2599_v61 = vld [vmem:[#allocation8 + $0x48] ss:$12 sps:$4 sm:$0xff]  }
  0xbd   : > { %2390 = vmatprep.subr.bf16.mxu1 %v2571_v14  ;;  %v2621_v59 = vld [vmem:[%s3139_s24] sm:$0xff]   ;;  %v1697_v60 = vunpack.c.l.bf16 %v1689_v56  ;;  %v2610_v1 = vld [vmem:[#allocation8 + $0x7c] ss:$12 sps:$4 sm:$0xff]   ;;  %v2619_v8 = vld [vmem:[#allocation8 + $0xac] ss:$12 sps:$4 sm:$0xff]   ;;  %s1278_s15 = sld [smem:[#allocation10]] }
  0xbe   : > { %1706 = vadd.xlane.f32.xlu1 %v1695_v47  ;;  %v2606_v62 = vld [vmem:[#allocation8 + $0x64] ss:$12 sps:$4 sm:$0xff]   ;;  %v2607_v63 = vld [vmem:[#allocation8 + $0x68] ss:$12 sps:$4 sm:$0xff]   ;;  %v2604_v0 = vld [vmem:[#allocation8 + $0x60] ss:$12 sps:$4 sm:$0xff]  }
  0xbf   : > { %681 = vmatpush1.bf16.msra.mxu0 %v2572_v15  ;;  %1708 = vadd.xlane.f32.xlu0 %v1696_v53  ;;  %v2611_v3 = vld [vmem:[#allocation8 + $0x80] ss:$12 sps:$4 sm:$0xff]   ;;  %v2608_v4 = vld [vmem:[#allocation8 + $0x78] ss:$12 sps:$4 sm:$0xff]   ;;  %v2613_v7 = vld [vmem:[#allocation8 + $0x90] ss:$12 sps:$4 sm:$0xff]  }
  0xc0   : > { %2391 = vmatpush3.bf16.msra.mxu1 %v2571_v14  ;;  %682 = vmatprep.subr.bf16.mxu0 %v2573_v16  ;;  %v2615_v5 = vld [vmem:[#allocation8 + $0x94] ss:$12 sps:$4 sm:$0xff]   ;;  %v2616_v6 = vld [vmem:[#allocation8 + $0x98] ss:$12 sps:$4 sm:$0xff]   ;;  %v2620_v9 = vld [vmem:[#allocation8 + $0xb0] ss:$12 sps:$4 sm:$0xff]  }
  0xc1   : > { %2392 = vmatprep.subr.bf16.mxu1 %v2575_v17  ;;  %v2617_v10 = vld [vmem:[#allocation8 + $0xa8] ss:$12 sps:$4 sm:$0xff]   ;;  %v1691_v12 = vand.u32 2147450879, %v3170_v51  ;;  %v1690_v13 = vand.u32 2147450879, %v3167_v50 }
  0xc2   : > { %1710 = vadd.xlane.f32.xlu1 %v1697_v60  ;;  %v2622_v11 = vld [vmem:[%s3139_s24 + $0x8] sm:$0xff]   ;;  %v3826_v18 = vmov 0.0   ;;  %v506_v34 = vshrl.u32 %v505_v33, 7  ;;  %s2280_s0 = sshll.u32 %s2934_s13, 2  ;;  %vm1788_vm8 = vcmask 64512  }
  0xc3   : > { %683 = vmatpush1.bf16.msra.mxu0 %v2576_v19  ;;  %v1699_v14 = vunpack.c.l.bf16 %v1691_v12  ;;  %v1698_v15 = vunpack.c.l.bf16 %v1690_v13  ;;  %v1279_v23 = vstv %s1278_s15  ;;  %p445_p8 = scmp.lt.s32.totalorder %s2280_s0, 7 }
  0xc4   : > { %2393 = vmatpush3.bf16.msra.mxu1 %v2575_v17  ;;  %684 = vmatprep.subr.bf16.mxu0 %v2577_v21  ;;  %v1201_v41 = vsub.s32 5, %v506_v34  ;;  %v1197_v43 = vsub.s32 3, %v506_v34 }
  0xc5   : > { %2394 = vmatprep.subr.bf16.mxu1 %v2579_v24  ;;  %1712 = vadd.xlane.f32.xlu0 %v1698_v15  ;;  %s3904_s0 = smov (!%p445_p8, %s2280_s0), 7 }
  0xc6   : > { %1714 = vadd.xlane.f32.xlu1 %v1699_v14  ;;  %s2346_s12 = sshll.u32 %s3904_s0, 5 }
  0xc7   : > { %685 = vmatpush1.bf16.msra.mxu0 %v2580_v27  ;;  %s3538_s30 = scalar_lea.vmem %s3823_s9, %s2346_s12  ;;  %s3751_s21 = scalar_lea.vmem %s3822_s8, %s2346_s12 }
  0xc8   : > { %2395 = vmatpush3.bf16.msra.mxu1 %v2579_v24  ;;  %686 = vmatprep.subr.bf16.mxu0 %v2581_v28 }
  0xc9   : > { %2396 = vmatprep.subr.bf16.mxu1 %v2583_v29 }
  0xcb   : > { %687 = vmatpush1.bf16.msra.mxu0 %v2584_v32 }
  0xcc   : > { %2397 = vmatpush3.bf16.msra.mxu1 %v2583_v29  ;;  %1023 = vmatprep.subr.bf16.mxu0 %v2589_v35  ;;  %v1137_v35 = vld [vmem:[%s3820_s6] sm:$0x7] }
  0xcd   : > { %2406 = vmatprep.subr.bf16.mxu1 %v2590_v36  ;;  %v1138_v37 = vunpack.c.l.bf16 %v1137_v35 }
  0xce   : > { %705 = vmatmul.mubr.bf16.vlgmr.msra.gmra.mrb[0].mxu0 %v2286_v22  ;;  %v1281_v22 = vstv %s2340_s14 }
  0xcf   : > { %2399 = vmatmul.mubr.bf16.vlgmr.msra.gmra.mrb[0].mxu1 %v2287_v39  ;;  %1024 = vmatpush1.bf16.msra.mxu0 %v2587_v38  ;;  %v3194_v38 = vsub.s32 0, %v506_v34  ;;  %v1202_v48 = vrot.slane %v1138_v37, %v1201_v41 }
  0xd0   : > { %2407 = vmatpush3.bf16.msra.mxu1 %v2590_v36  ;;  %1025 = vmatprep.subr.bf16.mxu0 %v2593_v40  ;;  %v3192_v36 = vsub.s32 1, %v506_v34  ;;  %v1150_v40 = vsub.s32 4, %v506_v34 }
  0xd1   : > { %2408 = vmatprep.subr.bf16.mxu1 %v2594_v42  ;;  %714 = vmatprep.mubr.bf16.mxu0 %v2863_v2  ;;  %v1143_v44 = vrot.slane %v1138_v37, %v3194_v38 }
  0xd2   : > { %2402 = vmatprep.mubr.bf16.mxu1 %v2288_v49  ;;  %v1151_v47 = vrot.slane %v1138_v37, %v1150_v40 }
  0xd3   : > { %1026 = vmatpush1.bf16.msra.mxu0 %v2591_v45  ;;  %v1194_v45 = vrot.slane %v1138_v37, %v3192_v36 }
  0xd4   : > { %2409 = vmatpush3.bf16.msra.mxu1 %v2594_v42  ;;  %1027 = vmatprep.subr.bf16.mxu0 %v2597_v46  ;;  %v503_v42 = vld [vmem:[%s3817_s3] sm:$0x7] }
  0xd5   : > { %2410 = vmatprep.subr.bf16.mxu1 %v2598_v52  ;;  %v3210_v50 = vrot.slane %v503_v42, %v3192_v36  ;;  %v3217_v56 = vrot.slane %v1194_v45, %v3192_v36 }
  0xd6   : > { %715 = vmatmul.mubr.bf16.gmra.mrb[4].mxu0 %v2287_v39  ;;  %v3196_v39 = vsub.s32 2, %v506_v34 }
  0xd7   : > { %2403 = vmatmul.mubr.bf16.gmra.mrb[4].mxu1 %v2289_v55  ;;  %1028 = vmatpush1.bf16.msra.mxu0 %v2595_v54 }
  0xd8   : > { %2411 = vmatpush3.bf16.msra.mxu1 %v2598_v52  ;;  %1029 = vmatprep.subr.bf16.mxu0 %v2601_v57  ;;  %v3204_v46 = vrot.slane %v503_v42, %v3196_v39  ;;  %v1147_v51 = vrot.slane %v1138_v37, %v3196_v39  ;;  %v1198_v52 = vrot.slane %v1138_v37, %v1197_v43 }
  0xd9   : > { %2412 = vmatprep.subr.bf16.mxu1 %v2602_v58  ;;  %724 = vmatprep.mubr.bf16.mxu0 %v2863_v2 }
  0xda   : > { %2422 = vmatprep.mubr.bf16.mxu1 %v2621_v59  ;;  %1289 = vperm.xlu1 %2532, %v1281_v22  }
  0xdb   : > { %1030 = vmatpush1.bf16.msra.mxu0 %v2599_v61  ;;  %1284 = vperm.xlu0 %2531, %v1279_v23  }
  0xdc   : > { %2413 = vmatpush3.bf16.msra.mxu1 %v2602_v58  ;;  %1031 = vmatprep.subr.bf16.mxu0 %v2606_v62  ;;  %v3221_v58 = vrot.slane %v1151_v47, %v3194_v38 }
  0xdd   : > { %2414 = vmatprep.subr.bf16.mxu1 %v2607_v63 }
  0xde   : > { %725 = vmatmul.mubr.bf16.gmra.mrb[8].mxu0 %v2288_v49  ;;  %v3207_v49 = vrot.slane %v503_v42, %v3194_v38 }
  0xdf   : > { %1032 = vmatpush1.bf16.msra.mxu0 %v2604_v0  ;;  %734 = vmatprep.mubr.bf16.mxu0 %v2863_v2 }
  0xe0   : > { %2415 = vmatpush3.bf16.msra.mxu1 %v2607_v63  ;;  %1033 = vmatprep.subr.bf16.mxu0 %v2610_v1 }
  0xe1   : > { %2416 = vmatprep.subr.bf16.mxu1 %v2611_v3 }
  0xe3   : > { %1034 = vmatpush1.bf16.msra.mxu0 %v2608_v4  ;;  %v3233_v4 = vrot.slane %v1198_v52, %v3192_v36 }
  0xe4   : > { %2417 = vmatpush3.bf16.msra.mxu1 %v2611_v3  ;;  %1035 = vmatprep.subr.bf16.mxu0 %v2615_v5  ;;  %v3230_v3 = vrot.slane %v1147_v51, %v3194_v38 }
  0xe5   : > { %2418 = vmatprep.subr.bf16.mxu1 %v2616_v6 }
  0xe6   : > { %735 = vmatmul.mubr.bf16.gmra.mrb[12].mxu0 %v2289_v55  ;;  %v3214_v55 = vrot.slane %v1143_v44, %v3194_v38 }
  0xe7   : > { %1036 = vmatpush1.bf16.msra.mxu0 %v2613_v7  ;;  %1055 = vmatprep.mubr.bf16.mxu0 %v2863_v2 }
  0xe8   : > { %2419 = vmatpush3.bf16.msra.mxu1 %v2616_v6  ;;  %1037 = vmatprep.subr.bf16.mxu0 %v2619_v8 }
  0xe9   : > { %2420 = vmatprep.subr.bf16.mxu1 %v2620_v9 }
  0xeb   : > { %1038 = vmatpush1.bf16.msra.mxu0 %v2617_v10 }
  0xec   : > { %2421 = vmatpush3.bf16.msra.mxu1 %v2620_v9 }
  0xee   : > { %1056 = vmatmul.mubr.bf16.vlgmr.msra.gmra.mrb[16].mxu0 %v2621_v59  ;;  %v3224_v59 = vrot.slane %v1202_v48, %v3192_v36 }
  0xef   : > { %2423 = vmatmul.mubr.bf16.vlgmr.msra.gmra.mrb[8].mxu1 %v2622_v11  ;;  %1065 = vmatprep.mubr.bf16.mxu0 %v2863_v2 }
  0xf6   : > { %1066 = vmatmul.mubr.bf16.gmra.mrb[20].mxu0 %v2622_v11 }
 0x144   : > { %v1701_v16 = vpop.xlane.xlu0 %1700 }
 0x145   : > { %vm1716_vm0 = vcmp.eq.f32.partialorder %v1701_v16, 0.0 }
 0x146   : > { %v1724_v19 = vsel %vm1716_vm0, -inf, %v3826_v18 }
 0x147   : > { %v1705_v17 = vpop.xlane.xlu1 %1704 }
 0x148   : > { %v1703_v20 = vpop.xlane.xlu0 %1702  ;;  %vm1718_vm2 = vcmp.eq.f32.partialorder %v1705_v17, 0.0 }
 0x149   : > { %vm1717_vm1 = vcmp.eq.f32.partialorder %v1703_v20, 0.0  ;;  %v1726_v25 = vsel %vm1718_vm2, -inf, %v3826_v18 }
 0x14a   : > { %v1725_v2 = vsel %vm1717_vm1, -inf, %v3826_v18 }
 0x14b   : > { %v1707_v21 = vpop.xlane.xlu1 %1706  ;;  %v2533_v24 = vpack.i.bf16 %v1725_v2, %v1724_v19 }
 0x14c   : > { %vm1719_vm3 = vcmp.eq.f32.partialorder %v1707_v21, 0.0  ;;  %v1709_v28 = vpop.xlane.xlu0 %1708 }
 0x14d   : > { %v1727_v26 = vsel %vm1719_vm3, -inf, %v3826_v18  ;;  %vm1720_vm5 = vcmp.eq.f32.partialorder %v1709_v28, 0.0  ;;  %2534 = vperm.xlu1 %2532, %v2533_v24  }
 0x14e   : > { %v2538_v29 = vpack.i.bf16 %v1727_v26, %v1726_v25  ;;  %v1728_v31 = vsel %vm1720_vm5, -inf, %v3826_v18 }
 0x14f   : > { %v1711_v27 = vpop.xlane.xlu1 %1710 }
 0x150   : > { %vm1721_vm4 = vcmp.eq.f32.partialorder %v1711_v27, 0.0 }
 0x151   : > { %v1729_v30 = vsel %vm1721_vm4, -inf, %v3826_v18  ;;  %2539 = vperm.xlu1 %2532, %v2538_v29  }
 0x152   : > { %v2543_v32 = vpack.i.bf16 %v1729_v30, %v1728_v31 }
 0x155   : > { %2544 = vperm.xlu1 %2532, %v2543_v32  }
 0x1a1   : > { %v706_v54 = vpop.f32.mrb[0].mxu0 }
 0x1a2   : > { %v2400_v53 = vpop.f32.mrb[0].mxu1  ;;  %v707_v61 = vadd.f32 %v706_v54, %v3207_v49  ;;  %v708_v62 = vpop.f32.mrb[1].mxu0 }
 0x1a3   : > { %v788_v57 = vadd.f32 %v2400_v53, %v3204_v46  ;;  %v779_v60 = vpop.f32.mrb[1].mxu1  ;;  %v709_v1 = vadd.f32 %v708_v62, %v3210_v50  ;;  %v710_v5 = vpop.f32.mrb[2].mxu0 }
 0x1a4   : > { %v780_v63 = vadd.f32 %v779_v60, %v3204_v46  ;;  %v2401_v0 = vpop.f32.mrb[2].mxu1  ;;  %v810_v7 = vmax.f32 %v707_v61, 0.0  ;;  %v711_v10 = vadd.f32 %v710_v5, %v3207_v49  ;;  %v712_v11 = vpop.f32.mrb[3].mxu0 }
 0x1a5   : > { %v818_v6 = vmax.f32 %v788_v57, 0.0  ;;  %v791_v8 = vadd.f32 %v2401_v0, %v3204_v46  ;;  %v782_v9 = vpop.f32.mrb[3].mxu1  ;;  %v811_v13 = vmax.f32 %v709_v1, 0.0  ;;  %v713_v15 = vadd.f32 %v712_v11, %v3210_v50 }
 0x1a6   : > { %v812_v12 = vmax.f32 %v780_v63, 0.0  ;;  %v783_v14 = vadd.f32 %v782_v9, %v3204_v46  ;;  %v3247_v20 = vmul.f32 %v3214_v55, %v810_v7  ;;  %v3250_v21 = vmul.f32 %v3217_v56, %v810_v7 }
 0x1a7   : > { %v3240_v16 = vmul.f32 %v3221_v58, %v818_v6  ;;  %v3243_v17 = vmul.f32 %v3224_v59, %v818_v6  ;;  %v821_v2 = vmax.f32 %v791_v8, 0.0  ;;  %v813_v24 = vmax.f32 %v711_v10, 0.0 }
 0x1a8   : > { %v1169_v19 = vmul.f32 %v3221_v58, %v812_v12  ;;  %v3253_v22 = vmul.f32 %v3224_v59, %v812_v12  ;;  %v815_v23 = vmax.f32 %v783_v14, 0.0  ;;  %v814_v25 = vmax.f32 %v713_v15, 0.0 }
 0x1a9   : > { %v3256_v26 = vmul.f32 %v3221_v58, %v821_v2  ;;  %v3259_v27 = vmul.f32 %v3224_v59, %v821_v2  ;;  %v1168_v28 = vmul.f32 %v3230_v3, %v811_v13  ;;  %v3263_v29 = vmul.f32 %v3233_v4, %v811_v13  ;;  %v716_v30 = vpop.f32.mrb[4].mxu0 }
 0x1aa   : > { %v2404_v31 = vpop.f32.mrb[4].mxu1  ;;  %v1172_v32 = vmul.f32 %v3221_v58, %v815_v23  ;;  %v3267_v33 = vmul.f32 %v3224_v59, %v815_v23  ;;  %v3270_v34 = vmul.f32 %v3214_v55, %v813_v24  ;;  %v3273_v35 = vmul.f32 %v3217_v56, %v813_v24  ;;  %v718_v37 = vpop.f32.mrb[5].mxu0 }
 0x1ab   : > { %v795_v40 = vpop.f32.mrb[5].mxu1  ;;  %v1171_v42 = vmul.f32 %v3230_v3, %v814_v25  ;;  %v3279_v43 = vmul.f32 %v3233_v4, %v814_v25  ;;  %v717_v44 = vadd.f32 %v716_v30, %v3207_v49  ;;  %v720_v45 = vpop.f32.mrb[6].mxu0  ;;  %v719_v52 = vadd.f32 %v718_v37, %v3210_v50 }
 0x1ac   : > { %v2405_v47 = vpop.f32.mrb[6].mxu1  ;;  %v721_v53 = vadd.f32 %v720_v45, %v3207_v49  ;;  %v722_v54 = vpop.f32.mrb[7].mxu0  ;;  %v1244_v61 = vpack.c.bf16 %v1172_v32, %v1169_v19  ;;  %v804_v5 = vadd.f32 %v2404_v31, %v3204_v46  ;;  %v796_v6 = vadd.f32 %v795_v40, %v3204_v46 }
 0x1ad   : > { %v798_v57 = vpop.f32.mrb[7].mxu1  ;;  %v816_v60 = vmax.f32 %v717_v44, 0.0  ;;  %v723_v62 = vadd.f32 %v722_v54, %v3210_v50  ;;  %v1243_v63 = vpack.c.bf16 %v1171_v42, %v1168_v28  ;;  %v817_v0 = vmax.f32 %v719_v52, 0.0 }
 0x1ae   : > { %v819_v1 = vmax.f32 %v721_v53, 0.0  ;;  %2428 = vmatprep.mubr.bf16.mxu0 %v1244_v61  ;;  %v807_v10 = vadd.f32 %v2405_v47, %v3204_v46  ;;  %v830_v23 = vmax.f32 %v804_v5, 0.0  ;;  %v824_v24 = vmax.f32 %v796_v6, 0.0 }
 0x1af   : > { %v3292_v7 = vmul.f32 %v3214_v55, %v816_v60  ;;  %v3295_v8 = vmul.f32 %v3217_v56, %v816_v60  ;;  %v820_v9 = vmax.f32 %v723_v62, 0.0  ;;  %1324 = vmatprep.mubr.bf16.mxu1 %v1243_v63  ;;  %v3299_v11 = vmul.f32 %v3230_v3, %v817_v0 }
 0x1b0   : > { %v3302_v12 = vmul.f32 %v3233_v4, %v817_v0  ;;  %v3305_v13 = vmul.f32 %v3214_v55, %v819_v1  ;;  %v3308_v14 = vmul.f32 %v3217_v56, %v819_v1  ;;  %v833_v31 = vmax.f32 %v807_v10, 0.0 }
 0x1b1   : > { %v3311_v15 = vmul.f32 %v3230_v3, %v820_v9  ;;  %v3314_v19 = vmul.f32 %v3233_v4, %v820_v9  ;;  %v726_v2 = vpop.f32.mrb[8].mxu0  ;;  %v799_v32 = vadd.f32 %v798_v57, %v3204_v46  ;;  %v3322_v42 = vmul.f32 %v3221_v58, %v830_v23 }
 0x1b2   : > { %v727_v28 = vadd.f32 %v726_v2, %v3207_v49  ;;  %v728_v30 = vpop.f32.mrb[9].mxu0  ;;  %v3325_v44 = vmul.f32 %v3224_v59, %v830_v23  ;;  %v3328_v45 = vmul.f32 %v3221_v58, %v824_v24  ;;  %v3332_v54 = vmul.f32 %v3224_v59, %v824_v24 }
 0x1b3   : > { %v729_v37 = vadd.f32 %v728_v30, %v3210_v50  ;;  %v730_v40 = vpop.f32.mrb[10].mxu0  ;;  %3858 = vst [vmem:[#allocation16_spill] sm:$0xff] %v3322_v42  ;;  %v3335_v46 = vmul.f32 %v3221_v58, %v833_v31  ;;  %v3339_v61 = vmul.f32 %v3224_v59, %v833_v31  ;;  %v827_v62 = vmax.f32 %v799_v32, 0.0 }
 0x1b4   : > { %3859 = vst [vmem:[#allocation17_spill] sm:$0xff] %v3325_v44  ;;  %v822_v47 = vmax.f32 %v727_v28, 0.0  ;;  %v731_v52 = vadd.f32 %v730_v40, %v3207_v49  ;;  %v732_v53 = vpop.f32.mrb[11].mxu0 }
 0x1b5   : > { %3860 = vst [vmem:[#allocation18_spill] sm:$0xff] %v3335_v46  ;;  %v823_v57 = vmax.f32 %v729_v37, 0.0  ;;  %v733_v60 = vadd.f32 %v732_v53, %v3210_v50  ;;  %3861 = vst [vmem:[#allocation19_spill] sm:$0xff] %v3339_v61  ;;  %v3364_v28 = vmul.f32 %v3221_v58, %v827_v62  ;;  %v3367_v30 = vmul.f32 %v3224_v59, %v827_v62 }
 0x1b6   : > { %v3342_v63 = vmul.f32 %v3214_v55, %v822_v47  ;;  %v3345_v0 = vmul.f32 %v3217_v56, %v822_v47  ;;  %v825_v1 = vmax.f32 %v731_v52, 0.0 }
 0x1b7   : > { %v3350_v6 = vmul.f32 %v3230_v3, %v823_v57  ;;  %v3353_v9 = vmul.f32 %v3233_v4, %v823_v57  ;;  %v826_v10 = vmax.f32 %v733_v60, 0.0 }
 0x1b8   : > { %v3358_v23 = vmul.f32 %v3214_v55, %v825_v1  ;;  %v3361_v24 = vmul.f32 %v3217_v56, %v825_v1  ;;  %v866_v1 = vld [vmem:[%s3819_s5] sm:$0x7] }
 0x1b9   : > { %v3370_v31 = vmul.f32 %v3230_v3, %v826_v10  ;;  %v3373_v32 = vmul.f32 %v3233_v4, %v826_v10  ;;  %v736_v37 = vpop.f32.mrb[12].mxu0 }
 0x1ba   : > { %v737_v52 = vadd.f32 %v736_v37, %v3207_v49  ;;  %v738_v53 = vpop.f32.mrb[13].mxu0  ;;  %v1715_v37 = vpop.xlane.xlu1 %1714 }
 0x1bb   : > { %v739_v60 = vadd.f32 %v738_v53, %v3210_v50  ;;  %v740_v62 = vpop.f32.mrb[14].mxu0  ;;  %v1713_v53 = vpop.xlane.xlu0 %1712  ;;  %vm1723_vm6 = vcmp.eq.f32.partialorder %v1715_v37, 0.0 }
 0x1bc   : > { %v828_v59 = vmax.f32 %v737_v52, 0.0  ;;  %v741_v58 = vadd.f32 %v740_v62, %v3207_v49  ;;  %v742_v41 = vpop.f32.mrb[15].mxu0  ;;  %v3407_v49 = vrot.slane %v866_v1, %v3194_v38  ;;  %v3410_v62 = vrot.slane %v866_v1, %v3196_v39 }
 0x1bd   : > { %v829_v25 = vmax.f32 %v739_v60, 0.0  ;;  %v743_v47 = vadd.f32 %v742_v41, %v3210_v50  ;;  %v875_v60 = vrot.slane %v866_v1, %v3192_v36  ;;  %vm1722_vm7 = vcmp.eq.f32.partialorder %v1713_v53, 0.0 }
 0x1be   : > { %v831_v52 = vmax.f32 %v741_v58, 0.0  ;;  %v3413_v57 = vmul.f32 %v3214_v55, %v828_v59  ;;  %v3416_v50 = vmul.f32 %v3217_v56, %v828_v59 }
 0x1bf   : > { %v832_v41 = vmax.f32 %v743_v47, 0.0  ;;  %v3420_v2 = vmul.f32 %v3230_v3, %v829_v25  ;;  %v3429_v39 = vmul.f32 %v3233_v4, %v829_v25 }
 0x1c0   : > { %3862 = vst [vmem:[#allocation20_spill] sm:$0xff] %v3413_v57  ;;  %3863 = vst [vmem:[#allocation21_spill] sm:$0xff] %v3416_v50  ;;  %v3423_v58 = vmul.f32 %v3214_v55, %v831_v52  ;;  %v3426_v38 = vmul.f32 %v3217_v56, %v831_v52 }
 0x1c1   : > { %3865 = vst [vmem:[#allocation23_spill] sm:$0xff] %v3429_v39  ;;  %v3432_v10 = vmul.f32 %v3230_v3, %v832_v41  ;;  %v3435_v47 = vmul.f32 %v3233_v4, %v832_v41  ;;  %v1057_v36 = vpop.f32.mrb[16].mxu0 }
 0x1c2   : > { %3864 = vst [vmem:[#allocation22_spill] sm:$0xff] %v3426_v38  ;;  %v2424_v59 = vpop.f32.mrb[8].mxu1  ;;  %v1058_v1 = vadd.f32 %v1057_v36, %v3407_v49  ;;  %v1059_v56 = vpop.f32.mrb[17].mxu0  ;;  %v3867_v36 = vmov 0.0  }
 0x1c3   : > { %3866 = vst [vmem:[#allocation24_spill] sm:$0xff] %v3435_v47  ;;  %v1110_v52 = vpop.f32.mrb[9].mxu1  ;;  %v1060_v40 = vadd.f32 %v1059_v56, %v875_v60  ;;  %v1061_v48 = vpop.f32.mrb[18].mxu0  ;;  %v1731_v44 = vsel %vm1723_vm6, -inf, %v3867_v36  ;;  %v1730_v25 = vsel %vm1722_vm7, -inf, %v3867_v36  ;;  %v1119_v53 = vadd.f32 %v2424_v59, %v3410_v62 }
 0x1c4   : > { %v1111_v3 = vadd.f32 %v1110_v52, %v3410_v62  ;;  %v2425_v5 = vpop.f32.mrb[10].mxu1  ;;  %v1125_v51 = vmax.f32 %v1058_v1, 0.0  ;;  %v1063_v18 = vpop.f32.mrb[19].mxu0  ;;  %v1062_v1 = vadd.f32 %v1061_v48, %v3407_v49  ;;  %v2548_v41 = vpack.i.bf16 %v1731_v44, %v1730_v25 }
 0x1c5   : > { %v1113_v55 = vpop.f32.mrb[11].mxu1  ;;  %v1126_v56 = vmax.f32 %v1060_v40, 0.0  ;;  %v1064_v50 = vadd.f32 %v1063_v18, %v875_v60  ;;  %v1133_v48 = vmax.f32 %v1119_v53, 0.0  ;;  %v3871_v59 = vpack.c.bf16 %v3311_v15, %v3299_v11 }
 0x1c6   : > { %v1127_v61 = vmax.f32 %v1111_v3, 0.0  ;;  %v1114_v52 = vadd.f32 %v1113_v55, %v3410_v62  ;;  %v1266_v57 = vpack.c.bf16 %v1125_v51, %v1125_v51  ;;  %v1128_v55 = vmax.f32 %v1062_v1, 0.0  ;;  %2549 = vperm.xlu1 %2532, %v2548_v41  }
 0x1c7   : > { %v1267_v38 = vpack.c.bf16 %v1126_v56, %v1126_v56  ;;  %v1129_v46 = vmax.f32 %v1064_v50, 0.0  ;;  %v3874_v11 = vpack.c.bf16 %v3314_v19, %v3302_v12  ;;  %v3875_v15 = vpack.c.bf16 %v3256_v26, %v3240_v16 }
 0x1c8   : > { %v1268_v42 = vpack.c.bf16 %v1127_v61, %v1127_v61  ;;  %v1130_v4 = vmax.f32 %v1114_v52, 0.0  ;;  %v1269_v44 = vpack.c.bf16 %v1128_v55, %v1128_v55  ;;  %v3878_v16 = vpack.c.bf16 %v3370_v31, %v3350_v6  ;;  %v3891_v31 = vld [vmem:[#allocation16_spill] sm:$0xff] }
 0x1c9   : > { %v1270_v47 = vpack.c.bf16 %v1129_v46, %v1129_v46  ;;  %1292 = vmatprep.subr.bf16.mxu1 %v1267_v38  ;;  %v1067_v37 = vpop.f32.mrb[20].mxu0  ;;  %v3868_v38 = vpack.c.bf16 %v3270_v34, %v3247_v20  ;;  %v3879_v26 = vpack.c.bf16 %v3364_v28, %v3328_v45  ;;  %v3884_v45 = vpack.c.bf16 %v3361_v24, %v3345_v0  ;;  %v3524_v24 = vpop.permute.xlu1 %1289 }
 0x1ca   : > { %v1271_v39 = vpack.c.bf16 %v1130_v4, %v1130_v4  ;;  %2426 = vmatprep.subr.bf16.mxu0 %v1268_v42  ;;  %1293 = vmatpush1.bf16.xpose.msra.mxu1 %v1266_v57  ;;  %v1069_v40 = vpop.f32.mrb[21].mxu0  ;;  %v1274_v57 = vpack.c.bf16 %v1133_v48, %v1133_v48  ;;  %v1068_v20 = vadd.f32 %v1067_v37, %v3407_v49 }
 0x1cb   : > { %2427 = vmatpush3.bf16.xpose.msra.mxu0 %v1268_v42  ;;  %v1070_v18 = vadd.f32 %v1069_v40, %v875_v60  ;;  %v1071_v61 = vpop.f32.mrb[22].mxu0  ;;  %v3869_v42 = vpack.c.bf16 %v3267_v33, %v3253_v22  ;;  %v1122_v22 = vadd.f32 %v2425_v5, %v3410_v62  ;;  %v3872_v33 = vpack.c.bf16 %v3273_v35, %v3250_v21 }
 0x1cc   : > { %2432 = vmatprep.subr.bf16.mxu1 %v1271_v39  ;;  %1390 = vmatprep.subr.bf16.mxu0 %v1270_v47  ;;  %v1073_v50 = vpop.f32.mrb[23].mxu0  ;;  %v3870_v47 = vpack.c.bf16 %v3279_v43, %v3263_v29  ;;  %v3873_v29 = vpack.c.bf16 %v3305_v13, %v3292_v7  ;;  %v1131_v43 = vmax.f32 %v1068_v20, 0.0  ;;  %v1072_v21 = vadd.f32 %v1071_v61, %v3407_v49  ;;  %v3894_v49 = vld [vmem:[#allocation21_spill] sm:$0xff] }
 0x1cd   : > { %v1132_v51 = vmax.f32 %v1070_v18, 0.0  ;;  %v1074_v46 = vadd.f32 %v1073_v50, %v875_v60  ;;  %v1136_v5 = vmax.f32 %v1122_v22, 0.0  ;;  %v3876_v7 = vpack.c.bf16 %v3308_v14, %v3295_v8  ;;  %v2535_v3 = vpop.permute.xlu1 %2534 }
 0x1ce   : > { %v1272_v62 = vpack.c.bf16 %v1131_v43, %v1131_v43  ;;  %v3877_v13 = vpack.c.bf16 %v3259_v27, %v3243_v17  ;;  %v1134_v12 = vmax.f32 %v1072_v21, 0.0  ;;  %v3880_v8 = vpack.c.bf16 %v3358_v23, %v3342_v63  ;;  %v3885_v63 = vld [vmem:[#allocation20_spill] sm:$0xff]  ;;  %v3888_v23 = vld [vmem:[#allocation23_spill] sm:$0xff] }
 0x1cf   : > { %v1273_v25 = vpack.c.bf16 %v1132_v51, %v1132_v51  ;;  %v1135_v60 = vmax.f32 %v1074_v46, 0.0  ;;  %v1277_v35 = vpack.c.bf16 %v1136_v5, %v1136_v5  ;;  %v3881_v17 = vpack.c.bf16 %v3367_v30, %v3332_v54  ;;  %v3887_v54 = vld [vmem:[#allocation24_spill] sm:$0xff]  ;;  %v3890_v30 = vld [vmem:[#allocation18_spill] sm:$0xff] }
 0x1d0   : > { %v1275_v19 = vpack.c.bf16 %v1134_v12, %v1134_v12  ;;  %v3882_v27 = vpack.c.bf16 %v3373_v32, %v3353_v9  ;;  %v3883_v14 = vpack.c.bf16 %v3432_v10, %v3420_v2  ;;  %v3886_v6 = vpack.c.bf16 %v3423_v58, %v3885_v63  ;;  %v3893_v32 = vld [vmem:[#allocation22_spill] sm:$0xff]  ;;  %v3896_v10 = vld [vmem:[#allocation19_spill] sm:$0xff]  ;;  %v3528_v58 = vpop.permute.xlu0 %1284 }
 0x1d1   : > { %1325 = vmatmul.mubr.bf16.vlgmr.msra.gmra.mrb[12].mxu1 %v3868_v38  ;;  %v1276_v34 = vpack.c.bf16 %v1135_v60, %v1135_v60  ;;  %v3889_v28 = vpack.c.bf16 %v3887_v54, %v3888_v23  ;;  %v3892_v9 = vpack.c.bf16 %v3890_v30, %v3891_v31  ;;  %v3895_v2 = vpack.c.bf16 %v3893_v32, %v3894_v49 }
 0x1d2   : > { %2429 = vmatmul.mubr.bf16.vlgmr.msra.gmra.mrb[24].mxu0 %v3869_v42  ;;  %1332 = vmatprep.mubr.bf16.mxu1 %v3870_v47  ;;  %v2536_v1 = vunpack.i.l.bf16 %v2535_v3  ;;  %v2537_v18 = vunpack.i.h.bf16 %v2535_v3 }
 0x1d3   : > { %1391 = vmatpush1.bf16.xpose.msra.mxu0 %v1269_v44  ;;  %1422 = vmatprep.mubr.bf16.mxu0 %v3871_v59 }
 0x1d4   : > { %2433 = vmatpush3.bf16.xpose.msra.mxu1 %v1271_v39  ;;  %2438 = vmatprep.subr.bf16.mxu0 %v1274_v57  ;;  %v3897_v39 = vld [vmem:[#allocation17_spill] sm:$0xff] }
 0x1d5   : > { %1488 = vmatprep.subr.bf16.mxu1 %v1273_v25  ;;  %v3898_v0 = vpack.c.bf16 %v3896_v10, %v3897_v39 }
 0x1d9   : > { %1333 = vmatmul.mubr.bf16.gmra.mrb[16].mxu1 %v3872_v33 }
 0x1da   : > { %1423 = vmatmul.mubr.bf16.vlgmr.msra.gmra.mrb[28].mxu0 %v3873_v29  ;;  %2434 = vmatprep.mubr.bf16.mxu1 %v3875_v15  ;;  %v2540_v15 = vpop.permute.xlu1 %2539 }
 0x1db   : > { %1430 = vmatprep.mubr.bf16.mxu0 %v3874_v11  ;;  %2439 = vmatpush3.bf16.xpose.msra.mxu0 %v1274_v57  ;;  %v2541_v12 = vunpack.i.l.bf16 %v2540_v15  ;;  %v2542_v23 = vunpack.i.h.bf16 %v2540_v15 }
 0x1dc   : > { %1586 = vmatprep.subr.bf16.mxu0 %v1276_v34 }
 0x1e1   : > { %2435 = vmatmul.mubr.bf16.vlgmr.msra.gmra.mrb[20].mxu1 %v3877_v13 }
 0x1e2   : > { %1431 = vmatmul.mubr.bf16.gmra.mrb[32].mxu0 %v3876_v7  ;;  %1489 = vmatpush1.bf16.xpose.msra.mxu1 %v1272_v62 }
 0x1e3   : > { %1520 = vmatprep.mubr.bf16.mxu1 %v3878_v16  ;;  %2440 = vmatprep.mubr.bf16.mxu0 %v3879_v26 }
 0x1e4   : > { %2444 = vmatprep.subr.bf16.mxu1 %v1277_v35 }
 0x1e9   : > { %1521 = vmatmul.mubr.bf16.vlgmr.msra.gmra.mrb[24].mxu1 %v3880_v8 }
 0x1ea   : > { %2441 = vmatmul.mubr.bf16.vlgmr.msra.gmra.mrb[36].mxu0 %v3881_v17  ;;  %2445 = vmatpush3.bf16.xpose.msra.mxu1 %v1277_v35 }
 0x1eb   : > { %1587 = vmatpush1.bf16.xpose.msra.mxu0 %v1275_v19  ;;  %1528 = vmatprep.mubr.bf16.mxu1 %v3882_v27 }
 0x1ec   : > { %1618 = vmatprep.mubr.bf16.mxu0 %v3883_v14 }
 0x1f1   : > { %1529 = vmatmul.mubr.bf16.gmra.mrb[28].mxu1 %v3884_v45 }
 0x1f2   : > { %1619 = vmatmul.mubr.bf16.vlgmr.msra.gmra.mrb[40].mxu0 %v3886_v6  ;;  %2446 = vmatprep.mubr.bf16.mxu1 %v3892_v9 }
 0x1f3   : > { %1626 = vmatprep.mubr.bf16.mxu0 %v3889_v28 }
 0x1f9   : > { %2447 = vmatmul.mubr.bf16.vlgmr.msra.gmra.mrb[32].mxu1 %v3898_v0 }
 0x1fa   : > { %1627 = vmatmul.mubr.bf16.gmra.mrb[44].mxu0 %v3895_v2  ;;  %v2545_v2 = vpop.permute.xlu1 %2544 }
 0x2a4   : > { %v1326_v4 = vpop.f32.mrb[12].mxu1 }
 0x2a5   : > { %v2430_v41 = vpop.f32.mrb[24].mxu0  ;;  %v1327_v36 = vadd.f32 %v1326_v4, %v3528_v58  ;;  %v1328_v56 = vpop.f32.mrb[13].mxu1 }
 0x2a6   : > { %v1375_v52 = vpop.f32.mrb[25].mxu0  ;;  %v1329_v37 = vpop.f32.mrb[14].mxu1 }
 0x2a7   : > { %v2431_v53 = vpop.f32.mrb[26].mxu0  ;;  %v1376_v40 = vadd.f32 %v1375_v52, %v1327_v36  ;;  %v1330_v61 = vadd.f32 %v1329_v37, %v3528_v58  ;;  %v1331_v55 = vpop.f32.mrb[15].mxu1  ;;  %v2546_v37 = vunpack.i.l.bf16 %v2545_v2 }
 0x2a8   : > { %v1378_v50 = vpop.f32.mrb[27].mxu0 }
 0x2a9   : > { %v3540_v51 = vadd.f32 %v2536_v1, %v1376_v40  ;;  %v1379_v48 = vadd.f32 %v1378_v50, %v1330_v61  ;;  %v2547_v50 = vunpack.i.h.bf16 %v2545_v2 }
 0x2ab   : > { %2085 = vst.msk [vmem:[%s3538_s30] sm:$0xff] %vm1788_vm8, %v3540_v51  ;;  %v3545_v44 = vadd.f32 %v2537_v18, %v1379_v48  ;;  %v1789_v25 = vsel %vm1788_vm8, %v3540_v51, -inf }
 0x2ac   : > { %v1334_v46 = vpop.f32.mrb[16].mxu1  ;;  %1790 = vmax.xlane.f32.xlu1 %v1789_v25 }
 0x2ad   : > { %v1424_v38 = vpop.f32.mrb[28].mxu0  ;;  %2086 = vst.msk [vmem:[%s3538_s30 + $0x8] sm:$0xff] %vm1788_vm8, %v3545_v44  ;;  %v1335_v42 = vadd.f32 %v1334_v46, %v3524_v24  ;;  %v1336_v57 = vpop.f32.mrb[17].mxu1  ;;  %v1792_v59 = vsel %vm1788_vm8, %v3545_v44, -inf }
 0x2ae   : > { %v1426_v47 = vpop.f32.mrb[29].mxu0  ;;  %v1337_v60 = vpop.f32.mrb[18].mxu1  ;;  %1793 = vmax.xlane.f32.xlu0 %v1792_v59  ;;  %v1425_v21 = vadd.f32 %v1424_v38, %v3528_v58 }
 0x2af   : > { %v1427_v20 = vpop.f32.mrb[30].mxu0  ;;  %v1384_v34 = vadd.f32 %v2430_v41, %v1335_v42  ;;  %v1338_v22 = vadd.f32 %v1337_v60, %v3524_v24  ;;  %v1339_v33 = vpop.f32.mrb[19].mxu1 }
 0x2b0   : > { %v1429_v29 = vpop.f32.mrb[31].mxu0  ;;  %v1428_v19 = vadd.f32 %v1427_v20, %v3528_v58 }
 0x2b1   : > { %v3556_v43 = vadd.f32 %v2536_v1, %v1384_v34  ;;  %v1387_v11 = vadd.f32 %v2431_v53, %v1338_v22 }
 0x2b3   : > { %2087 = vst.msk [vmem:[%s3538_s30 + $0x10] sm:$0xff] %vm1788_vm8, %v3556_v43  ;;  %v3561_v5 = vadd.f32 %v2537_v18, %v1387_v11  ;;  %v1795_v62 = vsel %vm1788_vm8, %v3556_v43, -inf }
 0x2b4   : > { %v2436_v7 = vpop.f32.mrb[20].mxu1  ;;  %1796 = vmax.xlane.f32.xlu1 %v1795_v62 }
 0x2b5   : > { %v1432_v35 = vpop.f32.mrb[32].mxu0  ;;  %2088 = vst.msk [vmem:[%s3538_s30 + $0x18] sm:$0xff] %vm1788_vm8, %v3561_v5  ;;  %v1473_v26 = vpop.f32.mrb[21].mxu1  ;;  %v1798_v54 = vsel %vm1788_vm8, %v3561_v5, -inf }
 0x2b6   : > { %v1433_v13 = vadd.f32 %v1432_v35, %v3524_v24  ;;  %v1434_v16 = vpop.f32.mrb[33].mxu0  ;;  %v1474_v8 = vadd.f32 %v1473_v26, %v1425_v21  ;;  %v2437_v27 = vpop.f32.mrb[22].mxu1 }
 0x2b7   : > { %v1435_v17 = vpop.f32.mrb[34].mxu0  ;;  %v1476_v6 = vpop.f32.mrb[23].mxu1 }
 0x2b8   : > { %v1482_v14 = vadd.f32 %v2436_v7, %v1433_v13  ;;  %v1436_v45 = vadd.f32 %v1435_v17, %v3524_v24  ;;  %v1437_v63 = vpop.f32.mrb[35].mxu0  ;;  %v3574_v28 = vadd.f32 %v2541_v12, %v1474_v8  ;;  %v1477_v30 = vadd.f32 %v1476_v6, %v1428_v19  ;;  %1799 = vmax.xlane.f32.xlu1 %v1798_v54  ;;  %v2550_v35 = vpop.permute.xlu1 %2549 }
 0x2b9   : > { %v2552_v2 = vunpack.i.h.bf16 %v2550_v35 }
 0x2ba   : > { %v3576_v31 = vadd.f32 %v2541_v12, %v1482_v14  ;;  %v1485_v9 = vadd.f32 %v2437_v27, %v1436_v45  ;;  %2089 = vst.msk [vmem:[%s3538_s30 + $0x20] sm:$0xff] %vm1788_vm8, %v3574_v28  ;;  %v3581_v32 = vadd.f32 %v2542_v23, %v1477_v30  ;;  %v1801_v49 = vsel %vm1788_vm8, %v3574_v28, -inf }
 0x2bb   : > { %1802 = vmax.xlane.f32.xlu0 %v1801_v49  ;;  %v2551_v14 = vunpack.i.l.bf16 %v2550_v35 }
 0x2bc   : > { %2091 = vst.msk [vmem:[%s3538_s30 + $0x30] sm:$0xff] %vm1788_vm8, %v3576_v31  ;;  %v3588_v10 = vadd.f32 %v2542_v23, %v1485_v9  ;;  %2090 = vst.msk [vmem:[%s3538_s30 + $0x28] sm:$0xff] %vm1788_vm8, %v3581_v32  ;;  %v1522_v39 = vpop.f32.mrb[24].mxu1  ;;  %v1804_v3 = vsel %vm1788_vm8, %v3581_v32, -inf  ;;  %v1807_v1 = vsel %vm1788_vm8, %v3576_v31, -inf }
 0x2bd   : > { %v2442_v0 = vpop.f32.mrb[36].mxu0  ;;  %v1523_v4 = vadd.f32 %v1522_v39, %v3528_v58  ;;  %v1524_v41 = vpop.f32.mrb[25].mxu1  ;;  %1805 = vmax.xlane.f32.xlu1 %v1804_v3 }
 0x2be   : > { %2092 = vst.msk [vmem:[%s3538_s30 + $0x38] sm:$0xff] %vm1788_vm8, %v3588_v10  ;;  %v1571_v36 = vpop.f32.mrb[37].mxu0  ;;  %v1525_v56 = vpop.f32.mrb[26].mxu1  ;;  %v1810_v55 = vsel %vm1788_vm8, %v3588_v10, -inf }
 0x2bf   : > { %v2443_v52 = vpop.f32.mrb[38].mxu0  ;;  %v1572_v53 = vadd.f32 %v1571_v36, %v1523_v4  ;;  %v1526_v40 = vadd.f32 %v1525_v56, %v3528_v58  ;;  %v1527_v18 = vpop.f32.mrb[27].mxu1  ;;  %1808 = vmax.xlane.f32.xlu0 %v1807_v1 }
 0x2c0   : > { %v1574_v61 = vpop.f32.mrb[39].mxu0 }
 0x2c1   : > { %v3604_v48 = vadd.f32 %v2546_v37, %v1572_v53  ;;  %v1575_v25 = vadd.f32 %v1574_v61, %v1526_v40  ;;  %1811 = vmax.xlane.f32.xlu1 %v1810_v55 }
 0x2c3   : > { %2093 = vst.msk [vmem:[%s3538_s30 + $0x40] sm:$0xff] %vm1788_vm8, %v3604_v48  ;;  %v3609_v46 = vadd.f32 %v2547_v50, %v1575_v25  ;;  %v1813_v38 = vsel %vm1788_vm8, %v3604_v48, -inf }
 0x2c4   : > { %v1530_v42 = vpop.f32.mrb[28].mxu1  ;;  %1814 = vmax.xlane.f32.xlu0 %v1813_v38 }
 0x2c5   : > { %v1620_v57 = vpop.f32.mrb[40].mxu0  ;;  %2094 = vst.msk [vmem:[%s3538_s30 + $0x48] sm:$0xff] %vm1788_vm8, %v3609_v46  ;;  %v1531_v47 = vadd.f32 %v1530_v42, %v3524_v24  ;;  %v1532_v59 = vpop.f32.mrb[29].mxu1  ;;  %v1816_v20 = vsel %vm1788_vm8, %v3609_v46, -inf }
 0x2c6   : > { %v1622_v60 = vpop.f32.mrb[41].mxu0  ;;  %v1533_v34 = vpop.f32.mrb[30].mxu1  ;;  %1817 = vmax.xlane.f32.xlu1 %v1816_v20  ;;  %v1621_v16 = vadd.f32 %v1620_v57, %v3528_v58 }
 0x2c7   : > { %v1623_v22 = vpop.f32.mrb[42].mxu0  ;;  %v1580_v33 = vadd.f32 %v2442_v0, %v1531_v47  ;;  %v1534_v29 = vadd.f32 %v1533_v34, %v3524_v24  ;;  %v1535_v11 = vpop.f32.mrb[31].mxu1 }
 0x2c8   : > { %v1625_v15 = vpop.f32.mrb[43].mxu0  ;;  %v1624_v45 = vadd.f32 %v1623_v22, %v3528_v58 }
 0x2c9   : > { %v3620_v62 = vadd.f32 %v2546_v37, %v1580_v33  ;;  %v1583_v21 = vadd.f32 %v2443_v52, %v1534_v29 }
 0x2cb   : > { %2095 = vst.msk [vmem:[%s3538_s30 + $0x50] sm:$0xff] %vm1788_vm8, %v3620_v62  ;;  %v3625_v7 = vadd.f32 %v2547_v50, %v1583_v21  ;;  %v1819_v13 = vsel %vm1788_vm8, %v3620_v62, -inf }
 0x2cc   : > { %v2448_v12 = vpop.f32.mrb[32].mxu1  ;;  %1820 = vmax.xlane.f32.xlu0 %v1819_v13 }
 0x2cd   : > { %v1628_v26 = vpop.f32.mrb[44].mxu0  ;;  %2096 = vst.msk [vmem:[%s3538_s30 + $0x58] sm:$0xff] %vm1788_vm8, %v3625_v7  ;;  %v1669_v17 = vpop.f32.mrb[33].mxu1  ;;  %v1822_v27 = vsel %vm1788_vm8, %v3625_v7, -inf }
 0x2ce   : > { %v1629_v19 = vadd.f32 %v1628_v26, %v3524_v24  ;;  %v1630_v8 = vpop.f32.mrb[45].mxu0  ;;  %v1670_v63 = vadd.f32 %v1669_v17, %v1621_v16  ;;  %v2449_v54 = vpop.f32.mrb[34].mxu1  ;;  %1823 = vmax.xlane.f32.xlu1 %v1822_v27 }
 0x2cf   : > { %v1631_v6 = vpop.f32.mrb[46].mxu0  ;;  %v1672_v49 = vpop.f32.mrb[35].mxu1 }
 0x2d0   : > { %v1678_v23 = vadd.f32 %v2448_v12, %v1629_v19  ;;  %v1632_v30 = vadd.f32 %v1631_v6, %v3524_v24  ;;  %v1633_v9 = vpop.f32.mrb[47].mxu0  ;;  %v3638_v39 = vadd.f32 %v2551_v14, %v1670_v63  ;;  %v1673_v0 = vadd.f32 %v1672_v49, %v1624_v45 }
 0x2d2   : > { %v3640_v3 = vadd.f32 %v2551_v14, %v1678_v23  ;;  %v1681_v4 = vadd.f32 %v2449_v54, %v1632_v30  ;;  %2097 = vst.msk [vmem:[%s3538_s30 + $0x60] sm:$0xff] %vm1788_vm8, %v3638_v39  ;;  %v3645_v58 = vadd.f32 %v2552_v2, %v1673_v0  ;;  %v1825_v41 = vsel %vm1788_vm8, %v3638_v39, -inf }
 0x2d3   : > { %1826 = vmax.xlane.f32.xlu0 %v1825_v41 }
 0x2d4   : > { %2099 = vst.msk [vmem:[%s3538_s30 + $0x70] sm:$0xff] %vm1788_vm8, %v3640_v3  ;;  %v3652_v24 = vadd.f32 %v2552_v2, %v1681_v4  ;;  %2098 = vst.msk [vmem:[%s3538_s30 + $0x68] sm:$0xff] %vm1788_vm8, %v3645_v58  ;;  %v1828_v36 = vsel %vm1788_vm8, %v3645_v58, -inf  ;;  %v1831_v56 = vsel %vm1788_vm8, %v3640_v3, -inf }
 0x2d5   : > { %1829 = vmax.xlane.f32.xlu1 %v1828_v36 }
 0x2d6   : > { %2100 = vst.msk [vmem:[%s3538_s30 + $0x78] sm:$0xff] %vm1788_vm8, %v3652_v24  ;;  %v1834_v52 = vsel %vm1788_vm8, %v3652_v24, -inf }
 0x2d7   : > { %1832 = vmax.xlane.f32.xlu0 %v1831_v56 }
 0x2d9   : > { %1835 = vmax.xlane.f32.xlu1 %v1834_v52 }
 0x339   : > { %v1791_v1 = vpop.xlane.xlu1 %1790 }
 0x33b   : > { %v1794_v37 = vpop.xlane.xlu0 %1793 }
 0x33c   : > { %v1837_v53 = vmax.f32 %v1791_v1, %v1794_v37 }
 0x33e   : > { %v1838_v40 = vrot.slane %v1837_v53, 4 }
 0x340   : > { %v1839_v18 = vmax.f32 %v1837_v53, %v1838_v40 }
 0x341   : > { %v1797_v61 = vpop.xlane.xlu1 %1796 }
 0x342   : > { %v1840_v55 = vrot.slane %v1839_v18, 2 }
 0x344   : > { %v1841_v50 = vmax.f32 %v1839_v18, %v1840_v55 }
 0x345   : > { %v1800_v25 = vpop.xlane.xlu1 %1799 }
 0x346   : > { %v1842_v38 = vrot.slane %v1841_v50, 1  ;;  %v1844_v42 = vmax.f32 %v1797_v61, %v1800_v25 }
 0x348   : > { %v1843_v57 = vmax.f32 %v1841_v50, %v1842_v38  ;;  %v1845_v47 = vrot.slane %v1844_v42, 4  ;;  %v1803_v59 = vpop.xlane.xlu0 %1802 }
 0x34a   : > { %v1893_v60 = vsub.f32 %v3540_v51, %v1843_v57  ;;  %v1894_v20 = vsub.f32 %v3545_v44, %v1843_v57  ;;  %v1846_v34 = vmax.f32 %v1844_v42, %v1845_v47  ;;  %v1806_v22 = vpop.xlane.xlu1 %1805 }
 0x34b   : > { %v1851_v33 = vmax.f32 %v1803_v59, %v1806_v22 }
 0x34c   : > { %v1909_v29 = vmul.f32 1.442695, %v1893_v60  ;;  %v1911_v11 = vmul.f32 1.442695, %v1894_v20  ;;  %v1847_v15 = vrot.slane %v1846_v34, 2  ;;  %v1809_v35 = vpop.xlane.xlu0 %1808 }
 0x34d   : > { %v1852_v21 = vrot.slane %v1851_v33, 4 }
 0x34e   : > { %2623 = vpow2.f32 %v1909_v29  ;;  %v1848_v13 = vmax.f32 %v1846_v34, %v1847_v15  ;;  %v1812_v16 = vpop.xlane.xlu1 %1811 }
 0x34f   : > { %2625 = vpow2.f32 %v1911_v11  ;;  %v1853_v26 = vmax.f32 %v1851_v33, %v1852_v21  ;;  %v1858_v12 = vmax.f32 %v1809_v35, %v1812_v16 }
 0x350   : > { %v1849_v19 = vrot.slane %v1848_v13, 1 }
 0x351   : > { %v1854_v8 = vrot.slane %v1853_v26, 2  ;;  %v1859_v17 = vrot.slane %v1858_v12, 4  ;;  %v1815_v14 = vpop.xlane.xlu0 %1814 }
 0x352   : > { %v1850_v51 = vmax.f32 %v1848_v13, %v1849_v19 }
 0x353   : > { %v1855_v27 = vmax.f32 %v1853_v26, %v1854_v8  ;;  %v1860_v44 = vmax.f32 %v1858_v12, %v1859_v17  ;;  %v1818_v45 = vpop.xlane.xlu1 %1817 }
 0x354   : > { %v1895_v63 = vsub.f32 %v3556_v43, %v1850_v51  ;;  %v1896_v6 = vsub.f32 %v3561_v5, %v1850_v51  ;;  %v1865_v54 = vmax.f32 %v1815_v14, %v1818_v45 }
 0x355   : > { %v1856_v23 = vrot.slane %v1855_v27, 1  ;;  %v1861_v30 = vrot.slane %v1860_v44, 2 }
 0x356   : > { %v1913_v9 = vmul.f32 1.442695, %v1895_v63  ;;  %v1915_v49 = vmul.f32 1.442695, %v1896_v6  ;;  %v1866_v2 = vrot.slane %v1865_v54, 4 }
 0x357   : > { %v1857_v0 = vmax.f32 %v1855_v27, %v1856_v23  ;;  %v1862_v4 = vmax.f32 %v1860_v44, %v1861_v30 }
 0x358   : > { %v3670_v41 = vpop.eup %2623  ;;  %2627 = vpow2.f32 %v1913_v9  ;;  %v1867_v36 = vmax.f32 %v1865_v54, %v1866_v2 }
 0x359   : > { %v3672_v56 = vpop.eup %2625  ;;  %2629 = vpow2.f32 %v1915_v49  ;;  %v1897_v52 = vsub.f32 %v3574_v28, %v1857_v0  ;;  %v1898_v43 = vsub.f32 %v3581_v32, %v1857_v0  ;;  %v1863_v5 = vrot.slane %v1862_v4, 1  ;;  %v1821_v55 = vpop.xlane.xlu0 %1820 }
 0x35a   : > { %v1868_v1 = vrot.slane %v1867_v36, 2  ;;  %v1944_v37 = vsel %vm1788_vm8, %v3672_v56, 0.0  ;;  %v1941_v53 = vsel %vm1788_vm8, %v3670_v41, 0.0 }
 0x35b   : > { %v1917_v40 = vmul.f32 1.442695, %v1897_v52  ;;  %v1919_v18 = vmul.f32 1.442695, %v1898_v43  ;;  %v1864_v61 = vmax.f32 %v1862_v4, %v1863_v5  ;;  %1945 = vadd.xlane.f32.xlu1 %v1944_v37  ;;  %1942 = vadd.xlane.f32.xlu0 %v1941_v53  ;;  %v1824_v50 = vpop.xlane.xlu1 %1823 }
 0x35c   : > { %v1869_v25 = vmax.f32 %v1867_v36, %v1868_v1  ;;  %v1872_v38 = vmax.f32 %v1821_v55, %v1824_v50 }
 0x35d   : > { %2631 = vpow2.f32 %v1917_v40  ;;  %v1899_v28 = vsub.f32 %v3576_v31, %v1864_v61  ;;  %v1900_v32 = vsub.f32 %v3588_v10, %v1864_v61 }
 0x35e   : > { %2633 = vpow2.f32 %v1919_v18  ;;  %v1870_v42 = vrot.slane %v1869_v25, 1  ;;  %v1873_v57 = vrot.slane %v1872_v38, 4 }
 0x35f   : > { %v1921_v47 = vmul.f32 1.442695, %v1899_v28  ;;  %v1923_v59 = vmul.f32 1.442695, %v1900_v32 }
 0x360   : > { %v1871_v60 = vmax.f32 %v1869_v25, %v1870_v42  ;;  %v1874_v20 = vmax.f32 %v1872_v38, %v1873_v57  ;;  %v1827_v34 = vpop.xlane.xlu0 %1826 }
 0x361   : > { %2635 = vpow2.f32 %v1921_v47 }
 0x362   : > { %v3682_v22 = vpop.eup %2627  ;;  %2637 = vpow2.f32 %v1923_v59  ;;  %v1901_v33 = vsub.f32 %v3604_v48, %v1871_v60  ;;  %v1902_v29 = vsub.f32 %v3609_v46, %v1871_v60  ;;  %v1875_v11 = vrot.slane %v1874_v20, 2  ;;  %v1830_v31 = vpop.xlane.xlu1 %1829 }
 0x363   : > { %v3686_v15 = vpop.eup %2629  ;;  %v1879_v10 = vmax.f32 %v1827_v34, %v1830_v31  ;;  %v1947_v21 = vsel %vm1788_vm8, %v3682_v22, 0.0 }
 0x364   : > { %v1925_v35 = vmul.f32 1.442695, %v1901_v33  ;;  %v1927_v13 = vmul.f32 1.442695, %v1902_v29  ;;  %v1876_v16 = vmax.f32 %v1874_v20, %v1875_v11  ;;  %v1950_v26 = vsel %vm1788_vm8, %v3686_v15, 0.0  ;;  %1948 = vadd.xlane.f32.xlu0 %v1947_v21  ;;  %v1833_v46 = vpop.xlane.xlu0 %1832 }
 0x365   : > { %v1880_v12 = vrot.slane %v1879_v10, 4  ;;  %1951 = vadd.xlane.f32.xlu1 %v1950_v26 }
 0x366   : > { %2639 = vpow2.f32 %v1925_v35  ;;  %v1877_v48 = vrot.slane %v1876_v16, 1  ;;  %v1836_v19 = vpop.xlane.xlu1 %1835 }
 0x367   : > { %v3692_v8 = vpop.eup %2631  ;;  %2641 = vpow2.f32 %v1927_v13  ;;  %v1881_v17 = vmax.f32 %v1879_v10, %v1880_v12  ;;  %v1886_v51 = vmax.f32 %v1833_v46, %v1836_v19 }
 0x368   : > { %v3694_v27 = vpop.eup %2633  ;;  %v1878_v44 = vmax.f32 %v1876_v16, %v1877_v48  ;;  %v1953_v14 = vsel %vm1788_vm8, %v3692_v8, 0.0 }
 0x369   : > { %v1882_v45 = vrot.slane %v1881_v17, 2  ;;  %v1887_v63 = vrot.slane %v1886_v51, 4  ;;  %v1956_v6 = vsel %vm1788_vm8, %v3694_v27, 0.0  ;;  %1954 = vadd.xlane.f32.xlu0 %v1953_v14 }
 0x36a   : > { %v1903_v54 = vsub.f32 %v3620_v62, %v1878_v44  ;;  %v1904_v23 = vsub.f32 %v3625_v7, %v1878_v44  ;;  %1957 = vadd.xlane.f32.xlu1 %v1956_v6 }
 0x36b   : > { %v3702_v30 = vpop.eup %2635  ;;  %v1883_v9 = vmax.f32 %v1881_v17, %v1882_v45  ;;  %v1888_v49 = vmax.f32 %v1886_v51, %v1887_v63 }
 0x36c   : > { %v3704_v2 = vpop.eup %2637  ;;  %v1929_v0 = vmul.f32 1.442695, %v1903_v54  ;;  %v1931_v4 = vmul.f32 1.442695, %v1904_v23  ;;  %v1959_v36 = vsel %vm1788_vm8, %v3702_v30, 0.0 }
 0x36d   : > { %v1884_v52 = vrot.slane %v1883_v9, 1  ;;  %v1889_v43 = vrot.slane %v1888_v49, 2  ;;  %v1962_v5 = vsel %vm1788_vm8, %v3704_v2, 0.0  ;;  %1960 = vadd.xlane.f32.xlu0 %v1959_v36 }
 0x36e   : > { %2643 = vpow2.f32 %v1929_v0  ;;  %1963 = vadd.xlane.f32.xlu1 %v1962_v5 }
 0x36f   : > { %2645 = vpow2.f32 %v1931_v4  ;;  %v1885_v62 = vmax.f32 %v1883_v9, %v1884_v52  ;;  %v1890_v7 = vmax.f32 %v1888_v49, %v1889_v43 }
 0x370   : > { %v3710_v1 = vpop.eup %2639 }
 0x371   : > { %v3712_v37 = vpop.eup %2641  ;;  %v1905_v53 = vsub.f32 %v3638_v39, %v1885_v62  ;;  %v1906_v40 = vsub.f32 %v3645_v58, %v1885_v62  ;;  %v1891_v18 = vrot.slane %v1890_v7, 1  ;;  %v1965_v61 = vsel %vm1788_vm8, %v3710_v1, 0.0 }
 0x372   : > { %v1968_v55 = vsel %vm1788_vm8, %v3712_v37, 0.0  ;;  %1966 = vadd.xlane.f32.xlu0 %v1965_v61 }
 0x373   : > { %v1933_v50 = vmul.f32 1.442695, %v1905_v53  ;;  %v1935_v25 = vmul.f32 1.442695, %v1906_v40  ;;  %v1892_v38 = vmax.f32 %v1890_v7, %v1891_v18  ;;  %1969 = vadd.xlane.f32.xlu1 %v1968_v55 }
 0x375   : > { %2647 = vpow2.f32 %v1933_v50  ;;  %v1907_v28 = vsub.f32 %v3640_v3, %v1892_v38  ;;  %v1908_v32 = vsub.f32 %v3652_v24, %v1892_v38 }
 0x376   : > { %2649 = vpow2.f32 %v1935_v25 }
 0x377   : > { %v1937_v39 = vmul.f32 1.442695, %v1907_v28  ;;  %v1939_v58 = vmul.f32 1.442695, %v1908_v32 }
 0x378   : > { %v3722_v42 = vpop.eup %2643 }
 0x379   : > { %v3724_v57 = vpop.eup %2645  ;;  %2651 = vpow2.f32 %v1937_v39  ;;  %v1971_v47 = vsel %vm1788_vm8, %v3722_v42, 0.0 }
 0x37a   : > { %2653 = vpow2.f32 %v1939_v58  ;;  %v1974_v59 = vsel %vm1788_vm8, %v3724_v57, 0.0  ;;  %1972 = vadd.xlane.f32.xlu0 %v1971_v47 }
 0x37b   : > { %1975 = vadd.xlane.f32.xlu1 %v1974_v59 }
 0x37f   : > { %v3730_v3 = vpop.eup %2647 }
 0x380   : > { %v3732_v24 = vpop.eup %2649  ;;  %v1977_v60 = vsel %vm1788_vm8, %v3730_v3, 0.0 }
 0x381   : > { %v1980_v20 = vsel %vm1788_vm8, %v3732_v24, 0.0  ;;  %1978 = vadd.xlane.f32.xlu0 %v1977_v60 }
 0x382   : > { %1981 = vadd.xlane.f32.xlu1 %v1980_v20 }
 0x383   : > { %v3738_v34 = vpop.eup %2651 }
 0x384   : > { %v3740_v33 = vpop.eup %2653  ;;  %v1983_v29 = vsel %vm1788_vm8, %v3738_v34, 0.0 }
 0x385   : > { %v1986_v11 = vsel %vm1788_vm8, %v3740_v33, 0.0  ;;  %1984 = vadd.xlane.f32.xlu0 %v1983_v29 }
 0x386   : > { %1987 = vadd.xlane.f32.xlu1 %v1986_v11 }
 0x3e8   : > { %v1943_v31 = vpop.xlane.xlu0 %1942  ;;  %v1946_v10 = vpop.xlane.xlu1 %1945 }
 0x3e9   : > { %v1989_v21 = vadd.f32 %v1946_v10, %v1943_v31 }
 0x3eb   : > { %v1990_v35 = vrot.slane %v1989_v21, 4 }
 0x3ed   : > { %v1991_v13 = vadd.f32 %v1990_v35, %v1989_v21 }
 0x3ef   : > { %v1992_v16 = vrot.slane %v1991_v13, 2 }
 0x3f1   : > { %v1993_v26 = vadd.f32 %v1992_v16, %v1991_v13  ;;  %v1949_v12 = vpop.xlane.xlu0 %1948 }
 0x3f2   : > { %v1952_v48 = vpop.xlane.xlu1 %1951 }
 0x3f3   : > { %v1994_v46 = vrot.slane %v1993_v26, 1  ;;  %v1996_v19 = vadd.f32 %v1952_v48, %v1949_v12 }
 0x3f5   : > { %v1995_v17 = vadd.f32 %v1994_v46, %v1993_v26  ;;  %v1997_v51 = vrot.slane %v1996_v19, 4 }
 0x3f6   : > { %v1955_v44 = vpop.xlane.xlu0 %1954 }
 0x3f7   : > { %2655 = vrcp.f32 %v1995_v17  ;;  %v1998_v14 = vadd.f32 %v1997_v51, %v1996_v19  ;;  %v1958_v45 = vpop.xlane.xlu1 %1957 }
 0x3f8   : > { %v2003_v63 = vadd.f32 %v1958_v45, %v1955_v44 }
 0x3f9   : > { %v1999_v6 = vrot.slane %v1998_v14, 2 }
 0x3fa   : > { %v2004_v54 = vrot.slane %v2003_v63, 4  ;;  %v1961_v23 = vpop.xlane.xlu0 %1960 }
 0x3fb   : > { %v2000_v9 = vadd.f32 %v1999_v6, %v1998_v14  ;;  %v1964_v49 = vpop.xlane.xlu1 %1963 }
 0x3fc   : > { %v2005_v0 = vadd.f32 %v2004_v54, %v2003_v63  ;;  %v2010_v4 = vadd.f32 %v1964_v49, %v1961_v23 }
 0x3fd   : > { %v2001_v36 = vrot.slane %v2000_v9, 1 }
 0x3fe   : > { %v2006_v52 = vrot.slane %v2005_v0, 2  ;;  %v2011_v43 = vrot.slane %v2010_v4, 4 }
 0x3ff   : > { %v2002_v5 = vadd.f32 %v2001_v36, %v2000_v9  ;;  %v1967_v62 = vpop.xlane.xlu0 %1966 }
 0x400   : > { %v2007_v7 = vadd.f32 %v2006_v52, %v2005_v0  ;;  %v2012_v53 = vadd.f32 %v2011_v43, %v2010_v4  ;;  %v1970_v40 = vpop.xlane.xlu1 %1969 }
 0x401   : > { %v2656_v18 = vpop.eup %2655  ;;  %2657 = vrcp.f32 %v2002_v5  ;;  %v2017_v61 = vadd.f32 %v1970_v40, %v1967_v62 }
 0x402   : > { %v2053_v55 = vmul.f32 %v2656_v18, %v3670_v41  ;;  %v2054_v50 = vmul.f32 %v2656_v18, %v3672_v56  ;;  %v2008_v25 = vrot.slane %v2007_v7, 1  ;;  %v2013_v38 = vrot.slane %v2012_v53, 2 }
 0x403   : > { %v2018_v28 = vrot.slane %v2017_v61, 4 }
 0x404   : > { %2069 = vst.msk [vmem:[%s3751_s21] sm:$0xff] %vm1788_vm8, %v2053_v55  ;;  %2070 = vst.msk [vmem:[%s3751_s21 + $0x8] sm:$0xff] %vm1788_vm8, %v2054_v50  ;;  %v2009_v32 = vadd.f32 %v2008_v25, %v2007_v7  ;;  %v2014_v39 = vadd.f32 %v2013_v38, %v2012_v53 }
 0x405   : > { %v2019_v58 = vadd.f32 %v2018_v28, %v2017_v61 }
 0x406   : > { %2659 = vrcp.f32 %v2009_v32  ;;  %v2015_v47 = vrot.slane %v2014_v39, 1 }
 0x407   : > { %v2020_v59 = vrot.slane %v2019_v58, 2  ;;  %v1973_v60 = vpop.xlane.xlu0 %1972 }
 0x408   : > { %v2016_v20 = vadd.f32 %v2015_v47, %v2014_v39  ;;  %v1976_v41 = vpop.xlane.xlu1 %1975 }
 0x409   : > { %v2021_v29 = vadd.f32 %v2020_v59, %v2019_v58  ;;  %v2024_v56 = vadd.f32 %v1976_v41, %v1973_v60 }
 0x40a   : > { %2661 = vrcp.f32 %v2016_v20 }
 0x40b   : > { %v2658_v11 = vpop.eup %2657  ;;  %v2022_v31 = vrot.slane %v2021_v29, 1  ;;  %v2025_v10 = vrot.slane %v2024_v56, 4 }
 0x40c   : > { %v2055_v21 = vmul.f32 %v2658_v11, %v3682_v22  ;;  %v2056_v35 = vmul.f32 %v2658_v11, %v3686_v15 }
 0x40d   : > { %v2023_v13 = vadd.f32 %v2022_v31, %v2021_v29  ;;  %v2026_v16 = vadd.f32 %v2025_v10, %v2024_v56 }
 0x40e   : > { %2071 = vst.msk [vmem:[%s3751_s21 + $0x10] sm:$0xff] %vm1788_vm8, %v2055_v21  ;;  %2072 = vst.msk [vmem:[%s3751_s21 + $0x18] sm:$0xff] %vm1788_vm8, %v2056_v35  ;;  %v1979_v26 = vpop.xlane.xlu0 %1978 }
 0x40f   : > { %2663 = vrcp.f32 %v2023_v13  ;;  %v2027_v12 = vrot.slane %v2026_v16, 2  ;;  %v1982_v48 = vpop.xlane.xlu1 %1981 }
 0x410   : > { %v2660_v46 = vpop.eup %2659  ;;  %v2031_v19 = vadd.f32 %v1982_v48, %v1979_v26 }
 0x411   : > { %v2057_v17 = vmul.f32 %v2660_v46, %v3692_v8  ;;  %v2058_v22 = vmul.f32 %v2660_v46, %v3694_v27  ;;  %v2028_v15 = vadd.f32 %v2027_v12, %v2026_v16 }
 0x412   : > { %v2032_v51 = vrot.slane %v2031_v19, 4  ;;  %v1985_v44 = vpop.xlane.xlu0 %1984 }
 0x413   : > { %2073 = vst.msk [vmem:[%s3751_s21 + $0x20] sm:$0xff] %vm1788_vm8, %v2057_v17  ;;  %2074 = vst.msk [vmem:[%s3751_s21 + $0x28] sm:$0xff] %vm1788_vm8, %v2058_v22  ;;  %v2029_v14 = vrot.slane %v2028_v15, 1  ;;  %v1988_v45 = vpop.xlane.xlu1 %1987 }
 0x414   : > { %v2662_v63 = vpop.eup %2661  ;;  %v2033_v6 = vadd.f32 %v2032_v51, %v2031_v19  ;;  %v2038_v54 = vadd.f32 %v1988_v45, %v1985_v44 }
 0x415   : > { %v2059_v23 = vmul.f32 %v2662_v63, %v3702_v30  ;;  %v2060_v8 = vmul.f32 %v2662_v63, %v3704_v2  ;;  %v2030_v27 = vadd.f32 %v2029_v14, %v2028_v15 }
 0x416   : > { %v2034_v9 = vrot.slane %v2033_v6, 2  ;;  %v2039_v49 = vrot.slane %v2038_v54, 4 }
 0x417   : > { %2075 = vst.msk [vmem:[%s3751_s21 + $0x30] sm:$0xff] %vm1788_vm8, %v2059_v23  ;;  %2076 = vst.msk [vmem:[%s3751_s21 + $0x38] sm:$0xff] %vm1788_vm8, %v2060_v8  ;;  %2665 = vrcp.f32 %v2030_v27 }
 0x418   : > { %v2035_v0 = vadd.f32 %v2034_v9, %v2033_v6  ;;  %v2040_v4 = vadd.f32 %v2039_v49, %v2038_v54 }
 0x419   : > { %v2664_v36 = vpop.eup %2663 }
 0x41a   : > { %v2061_v52 = vmul.f32 %v2664_v36, %v3710_v1  ;;  %v2062_v30 = vmul.f32 %v2664_v36, %v3712_v37  ;;  %v2036_v43 = vrot.slane %v2035_v0, 1  ;;  %v2041_v5 = vrot.slane %v2040_v4, 2 }
 0x41c   : > { %2077 = vst.msk [vmem:[%s3751_s21 + $0x40] sm:$0xff] %vm1788_vm8, %v2061_v52  ;;  %2078 = vst.msk [vmem:[%s3751_s21 + $0x48] sm:$0xff] %vm1788_vm8, %v2062_v30  ;;  %v2037_v2 = vadd.f32 %v2036_v43, %v2035_v0  ;;  %v2042_v62 = vadd.f32 %v2041_v5, %v2040_v4 }
 0x41e   : > { %2667 = vrcp.f32 %v2037_v2  ;;  %v2043_v7 = vrot.slane %v2042_v62, 1 }
 0x420   : > { %v2044_v53 = vadd.f32 %v2043_v7, %v2042_v62 }
 0x421   : > { %v2666_v40 = vpop.eup %2665 }
 0x422   : > { %v2063_v1 = vmul.f32 %v2666_v40, %v3722_v42  ;;  %v2064_v37 = vmul.f32 %v2666_v40, %v3724_v57  ;;  %2669 = vrcp.f32 %v2044_v53 }
 0x424   : > { %2079 = vst.msk [vmem:[%s3751_s21 + $0x50] sm:$0xff] %vm1788_vm8, %v2063_v1  ;;  %2080 = vst.msk [vmem:[%s3751_s21 + $0x58] sm:$0xff] %vm1788_vm8, %v2064_v37 }
 0x428   : > { %v2668_v18 = vpop.eup %2667 }
 0x429   : > { %v2065_v61 = vmul.f32 %v2668_v18, %v3730_v3  ;;  %v2066_v55 = vmul.f32 %v2668_v18, %v3732_v24 }
 0x42b   : > { %2081 = vst.msk [vmem:[%s3751_s21 + $0x60] sm:$0xff] %vm1788_vm8, %v2065_v61  ;;  %2082 = vst.msk [vmem:[%s3751_s21 + $0x68] sm:$0xff] %vm1788_vm8, %v2066_v55 }
 0x42c   : > { %v2670_v50 = vpop.eup %2669 }
 0x42d   : > { %v2067_v25 = vmul.f32 %v2670_v50, %v3738_v34  ;;  %v2068_v42 = vmul.f32 %v2670_v50, %v3740_v33 }
 0x42f   : > { %2083 = vst.msk [vmem:[%s3751_s21 + $0x70] sm:$0xff] %vm1788_vm8, %v2067_v25  ;;  %2084 = vst.msk [vmem:[%s3751_s21 + $0x78] sm:$0xff] %vm1788_vm8, %v2068_v42 }
 0x430 PF: > { %p25_p9 = scmp.ge.s32.totalorder %s3029_s20, 4   ;;  %s3899_s30 = smov %s2844_s10 }
 0x431   : > { %s3900_s10 = smov %s2848_s11  ;;  %s3901_s11 = smov %s3039_s18 }
 0x432   : > { %s3902_s12 = smov %s3029_s20  ;;  %27 = sbr.rel (!%p25_p9) target bundleno = 12 (0xc), region = 130 }
 0x439   :  { %2144 = vsyncpa [#allocation3], 1 }
 0x43a   :  { %2146 = vsyncpa [#allocation3 + $0x1], 1 }
 0x43b   :  { %2147 = vsyncpa [#allocation6], 1 }
 0x43c   :  { %2149 = vsyncpa [#allocation6 + $0x1], 1 }
 0x43d   :  { %2150 = vsyncpa [#allocation9], 1 }
 0x43e   :  { %2151 = vsyncpa [#allocation4], 1 }
 0x43f   :  { %2153 = vsyncpa [#allocation4 + $0x1], 1 }

</bundles_post_ra>
